<compile_context>
chip_gen: v5e
topology: v5e:2x2
jax: 0.10.0
libtpu: 0.0.40
codegen_flags: <defaults>
</compile_context>

<pallas_src>
import functools
import math

import jax
import jax.numpy as jnp
from jax import lax
from jax.experimental import pallas as pl
from jax.experimental.pallas import tpu as pltpu

# ----------------------------- small config ---------------------------------
B = 2                 # batch
S = 16                # sequence length
H = 128               # hidden size     (bert: 768)
NH = 2                # num heads       (bert: 12)
HD = H // NH          # head dim
FF = 256              # intermediate    (bert: 3072)
L = 2                 # num layers      (bert: 12)
VOCAB = 100
NUM_LABELS = 2
LOGITS_PAD = 128      # lane-dense padded classifier width
LN_EPS = 1e-12
DTYPE = jnp.float32
WDTYPE = jnp.bfloat16  # MXU operand dtype (f32 accumulation)


# --------------------------- fused encoder kernel ----------------------------
def _fused_encoder_kernel(
    x_ref, eg_ref, eb_ref, mb_ref,
    wqkv_ref, bqkv_ref, wo_ref, bo_ref, l1g_ref, l1b_ref,
    w1_ref, b1_ref, w2_ref, b2_ref, l2g_ref, l2b_ref,
    wp_ref, bp_ref, wc_ref, bc_ref,
    hid_ref, logits_ref,
):
    """grid = (B, L).  One batch's (S, H) activation slab stays resident in the
    output block `hid_ref` across all L layer steps."""
    l = pl.program_id(1)
    scale = 1.0 / math.sqrt(HD)

    def layer_norm(x, g, b):
        mu = jnp.mean(x, axis=-1, keepdims=True)
        var = jnp.mean((x - mu) ** 2, axis=-1, keepdims=True)
        return (x - mu) * lax.rsqrt(var + LN_EPS) * g + b

    # embeddings LayerNorm, only on the first layer step of this batch.
    @pl.when(l == 0)
    def _():
        hid_ref[...] = layer_norm(
            x_ref[...].astype(jnp.float32), eg_ref[...], eb_ref[...]
        )

    x = hid_ref[...]                       # (S, H) f32, VMEM-resident
    xb = x.astype(WDTYPE)

    # ---- fused QKV projection: (S, H) @ (H, 3H) ----
    qkv = jnp.dot(xb, wqkv_ref[0], preferred_element_type=jnp.float32) + bqkv_ref[0]

    bias = mb_ref[0]                       # (1, S) additive mask bias, f32
    wo = wo_ref[0]                         # (H, H) bf16

    # ---- per-head attention; ctx_h @ Wo[head rows] summed (no concat / transpose)
    attn = None
    for h in range(NH):
        qh = qkv[:, h * HD:(h + 1) * HD]
        kh = qkv[:, H + h * HD: H + (h + 1) * HD]
        vh = qkv[:, 2 * H + h * HD: 2 * H + (h + 1) * HD]
        # (S,HD) x (S,HD) contracting last dims -> (S,S), no explicit k.T
        s = lax.dot_general(
            qh.astype(WDTYPE), kh.astype(WDTYPE),
            (((1,), (1,)), ((), ())),
            preferred_element_type=jnp.float32,
        ) * scale
        s = s + bias                                   # f32 mask bias
        s = s - jnp.max(s, axis=-1, keepdims=True)
        p = jnp.exp(s)
        p = p * pl.reciprocal(jnp.sum(p, axis=-1, keepdims=True), approx=True)
        ctx_h = jnp.dot(p.astype(WDTYPE), vh.astype(WDTYPE),
                        preferred_element_type=jnp.float32)        # (S, HD)
        part = jnp.dot(ctx_h.astype(WDTYPE), wo[h * HD:(h + 1) * HD, :],
                       preferred_element_type=jnp.float32)          # (S, H)
        attn = part if attn is None else attn + part
    attn_out = attn + bo_ref[0]
    x1 = layer_norm(x + attn_out, l1g_ref[0], l1b_ref[0])

    # ---- feed-forward ----
    ff = jnp.dot(x1.astype(WDTYPE), w1_ref[0],
                 preferred_element_type=jnp.float32) + b1_ref[0]
    # TODO(synk): reference BERT uses exact erf GELU; tanh approximation kept here.
    ff = jax.nn.gelu(ff, approximate=True)
    ff = jnp.dot(ff.astype(WDTYPE), w2_ref[0],
                 preferred_element_type=jnp.float32) + b2_ref[0]
    x2 = layer_norm(x1 + ff, l2g_ref[0], l2b_ref[0])
    hid_ref[...] = x2

    # ---- BertPooler (Linear+tanh on every token) + classifier, last layer only
    @pl.when(l == pl.num_programs(1) - 1)
    def _():
        pooled = jnp.tanh(
            jnp.dot(x2.astype(WDTYPE), wp_ref[...],
                    preferred_element_type=jnp.float32) + bp_ref[...]
        )
        logits_ref[...] = (
            jnp.dot(pooled.astype(WDTYPE), wc_ref[...],
                    preferred_element_type=jnp.float32) + bc_ref[...]
        )


def fused_encoder(x_emb, mask_bias, p):
    """x_emb: (B*S, H) f32 embeddings (pre-LN); mask_bias: (B, 1, S) f32."""
    in_specs = [
        pl.BlockSpec((S, H), lambda b, l: (b, 0)),             # x_emb
        pl.BlockSpec((1, H), lambda b, l: (0, 0)),             # emb_ln_g
        pl.BlockSpec((1, H), lambda b, l: (0, 0)),             # emb_ln_b
        pl.BlockSpec((1, 1, S), lambda b, l: (b, 0, 0)),       # mask_bias
        pl.BlockSpec((1, H, 3 * H), lambda b, l: (l, 0, 0)),   # wqkv
        pl.BlockSpec((1, 1, 3 * H), lambda b, l: (l, 0, 0)),   # bqkv
        pl.BlockSpec((1, H, H), lambda b, l: (l, 0, 0)),       # wo
        pl.BlockSpec((1, 1, H), lambda b, l: (l, 0, 0)),       # bo
        pl.BlockSpec((1, 1, H), lambda b, l: (l, 0, 0)),       # ln1_g
        pl.BlockSpec((1, 1, H), lambda b, l: (l, 0, 0)),       # ln1_b
        pl.BlockSpec((1, H, FF), lambda b, l: (l, 0, 0)),      # w1
        pl.BlockSpec((1, 1, FF), lambda b, l: (l, 0, 0)),      # b1
        pl.BlockSpec((1, FF, H), lambda b, l: (l, 0, 0)),      # w2
        pl.BlockSpec((1, 1, H), lambda b, l: (l, 0, 0)),       # b2
        pl.BlockSpec((1, 1, H), lambda b, l: (l, 0, 0)),       # ln2_g
        pl.BlockSpec((1, 1, H), lambda b, l: (l, 0, 0)),       # ln2_b
        pl.BlockSpec((H, H), lambda b, l: (0, 0)),             # wp
        pl.BlockSpec((1, H), lambda b, l: (0, 0)),             # bp
        pl.BlockSpec((H, LOGITS_PAD), lambda b, l: (0, 0)),    # wc_pad
        pl.BlockSpec((1, LOGITS_PAD), lambda b, l: (0, 0)),    # bc_pad
    ]
    out_specs = [
        pl.BlockSpec((S, H), lambda b, l: (b, 0)),             # hidden states
        pl.BlockSpec((S, LOGITS_PAD), lambda b, l: (b, 0)),    # padded logits
    ]
    out_shape = [
        jax.ShapeDtypeStruct((B * S, H), DTYPE),
        jax.ShapeDtypeStruct((B * S, LOGITS_PAD), DTYPE),
    ]
    hidden, logits_pad = pl.pallas_call(
        _fused_encoder_kernel,
        grid=(B, L),
        in_specs=in_specs,
        out_specs=out_specs,
        out_shape=out_shape,
        compiler_params=pltpu.CompilerParams(
            dimension_semantics=("parallel", "arbitrary")),
    )(
        x_emb, p["emb_ln_g"], p["emb_ln_b"], mask_bias,
        p["wqkv"], p["bqkv"], p["wo"], p["bo"], p["ln1_g"], p["ln1_b"],
        p["w1"], p["b1"], p["w2"], p["b2"], p["ln2_g"], p["ln2_b"],
        p["wp"], p["bp"], p["wc_pad"], p["bc_pad"],
    )
    return hidden, logits_pad


# ------------------------------ parameters -----------------------------------
def init_params(key):
    std = 0.02

    def normal(k, shape):
        return (std * jax.random.normal(k, shape)).astype(DTYPE)

    keys = iter(jax.random.split(key, 5 + 6 * L))
    word_emb = normal(next(keys), (VOCAB, H))
    pos_emb = normal(next(keys), (S, H))
    type_emb = normal(next(keys), (2, H))
    wp = normal(next(keys), (H, H))
    wc = normal(next(keys), (H, NUM_LABELS))

    wqkv, wo, w1, w2 = [], [], [], []
    for _ in range(L):
        wq = normal(next(keys), (H, H))
        wk = normal(next(keys), (H, H))
        wv = normal(next(keys), (H, H))
        wqkv.append(jnp.concatenate([wq, wk, wv], axis=1))     # (H, 3H)
        wo.append(normal(next(keys), (H, H)))
        w1.append(normal(next(keys), (H, FF)))
        w2.append(normal(next(keys), (FF, H)))

    wc_pad = jnp.zeros((H, LOGITS_PAD), DTYPE).at[:, :NUM_LABELS].set(wc)

    p = {
        "word_emb": word_emb,
        "pos_emb": pos_emb,
        "type_emb": type_emb,
        "emb_ln_g": jnp.ones((1, H), DTYPE),
        "emb_ln_b": jnp.zeros((1, H), DTYPE),
        # stacked per-layer weights (MXU operands in bf16, f32 accumulation)
        "wqkv": jnp.stack(wqkv).astype(WDTYPE),                # (L, H, 3H)
        "bqkv": jnp.zeros((L, 1, 3 * H), DTYPE),
        "wo": jnp.stack(wo).astype(WDTYPE),                    # (L, H, H)
        "bo": jnp.zeros((L, 1, H), DTYPE),
        "ln1_g": jnp.ones((L, 1, H), DTYPE),
        "ln1_b": jnp.zeros((L, 1, H), DTYPE),
        "w1": jnp.stack(w1).astype(WDTYPE),                    # (L, H, FF)
        "b1": jnp.zeros((L, 1, FF), DTYPE),
        "w2": jnp.stack(w2).astype(WDTYPE),                    # (L, FF, H)
        "b2": jnp.zeros((L, 1, H), DTYPE),
        "ln2_g": jnp.ones((L, 1, H), DTYPE),
        "ln2_b": jnp.zeros((L, 1, H), DTYPE),
        # pooler + classifier (biases zero, per init_parameters())
        "wp": wp.astype(WDTYPE),
        "bp": jnp.zeros((1, H), DTYPE),
        "wc_pad": wc_pad.astype(WDTYPE),                       # (H, 128) lane-dense
        "bc_pad": jnp.zeros((1, LOGITS_PAD), DTYPE),
    }
    return p


# ------------------------------ forward pass ----------------------------------
@jax.jit
def _forward_core(params, input_ids, labels, input_mask):
    b, s = input_ids.shape

    # embeddings (gather is glue); LayerNorm happens inside the fused kernel.
    x = (
        jnp.take(params["word_emb"], input_ids, axis=0)
        + params["pos_emb"][None, :s, :]
        + params["type_emb"][0][None, None, :]
    )
    x_emb = x.reshape(b * s, H).astype(DTYPE)
    # additive attention-mask bias, precomputed once (loop-invariant).
    mask_bias = ((1.0 - input_mask.astype(jnp.float32)) * (-1e9)).reshape(b, 1, s)

    _hidden, logits_pad = fused_encoder(x_emb, mask_bias, params)
    logits2 = logits_pad[:, :NUM_LABELS]                       # (B*S, 2)

    # masked cross-entropy losses (mean over span / zero positions)
    labels_flat = labels.reshape(-1)
    logp = jax.nn.log_softmax(logits2.astype(jnp.float32), axis=-1)
    span_mask = (labels_flat == 1).astype(jnp.float32)
    zero_mask = (labels_flat == 0).astype(jnp.float32)
    span_loss = -jnp.sum(logp[:, 1] * span_mask) / jnp.maximum(jnp.sum(span_mask), 1.0)
    zero_loss = -jnp.sum(logp[:, 0] * zero_mask) / jnp.maximum(jnp.sum(zero_mask), 1.0)

    logits = logits2.reshape(b, s, NUM_LABELS)
    return span_loss, zero_loss, logits


def bert_bmt_forward(params, input_ids, labels, input_mask):
    span_loss, zero_loss, logits = _forward_core(params, input_ids, labels, input_mask)
    # TODO(synk): logits[labels==1] is inherently dynamic-shape; kept as eager glue.
    span_logits = logits[labels == 1]
    zero_logits = logits[labels == 0]
    return span_loss, zero_loss, span_logits, zero_logits


# ----------------------------------- main -------------------------------------
if __name__ == "__main__":
    key = jax.random.PRNGKey(0)
    kp, ki, kl, km = jax.random.split(key, 4)

    params = init_params(kp)
    input_ids = jax.random.randint(ki, (B, S), 0, VOCAB, dtype=jnp.int32)
    labels = jax.random.randint(kl, (B, S), 0, 2, dtype=jnp.int32)   # 0/1 targets
    input_mask = jnp.ones((B, S), dtype=jnp.int32)

    span_loss, zero_loss, span_logits, zero_logits = bert_bmt_forward(
        params, input_ids, labels, input_mask
    )
    jax.block_until_ready((span_loss, zero_loss, span_logits, zero_logits))

    assert span_logits.shape[-1] == NUM_LABELS
    assert zero_logits.shape[-1] == NUM_LABELS
    assert jnp.isfinite(span_loss) and jnp.isfinite(zero_loss)
    print("KERNEL_OK")
</pallas_src>

<mosaic_0001>
module attributes {stable_mosaic.version = 11 : i64} {
  func.func @_fused_encoder_kernel(%arg0: i32, %arg1: i32, %arg2: memref<16x128xf32, #tpu.memory_space<vmem>>, %arg3: memref<1x128xf32, #tpu.memory_space<vmem>>, %arg4: memref<1x128xf32, #tpu.memory_space<vmem>>, %arg5: memref<1x1x16xf32, #tpu.memory_space<vmem>>, %arg6: memref<1x128x384xbf16, #tpu.memory_space<vmem>>, %arg7: memref<1x1x384xf32, #tpu.memory_space<vmem>>, %arg8: memref<1x128x128xbf16, #tpu.memory_space<vmem>>, %arg9: memref<1x1x128xf32, #tpu.memory_space<vmem>>, %arg10: memref<1x1x128xf32, #tpu.memory_space<vmem>>, %arg11: memref<1x1x128xf32, #tpu.memory_space<vmem>>, %arg12: memref<1x128x256xbf16, #tpu.memory_space<vmem>>, %arg13: memref<1x1x256xf32, #tpu.memory_space<vmem>>, %arg14: memref<1x256x128xbf16, #tpu.memory_space<vmem>>, %arg15: memref<1x1x128xf32, #tpu.memory_space<vmem>>, %arg16: memref<1x1x128xf32, #tpu.memory_space<vmem>>, %arg17: memref<1x1x128xf32, #tpu.memory_space<vmem>>, %arg18: memref<128x128xbf16, #tpu.memory_space<vmem>>, %arg19: memref<1x128xf32, #tpu.memory_space<vmem>>, %arg20: memref<128x128xbf16, #tpu.memory_space<vmem>>, %arg21: memref<1x128xf32, #tpu.memory_space<vmem>>, %arg22: memref<16x128xf32, #tpu.memory_space<vmem>>, %arg23: memref<16x128xf32, #tpu.memory_space<vmem>>) attributes {dimension_semantics = [#tpu.dimension_semantics<parallel>, #tpu.dimension_semantics<arbitrary>], iteration_bounds = array<i64: 2, 2>, scalar_prefetch = 0 : i64, scratch_operands = 0 : i64, tpu.core_type = #tpu.core_type<tc>, window_params = [{transform_indices = @transform_0, window_bounds = array<i64: 16, 128>}, {pipeline_mode = #tpu.pipeline_mode<synchronous>, transform_indices = @transform_1, window_bounds = array<i64: 1, 128>}, {pipeline_mode = #tpu.pipeline_mode<synchronous>, transform_indices = @transform_2, window_bounds = array<i64: 1, 128>}, {transform_indices = @transform_3, window_bounds = array<i64: 1, 1, 16>}, {transform_indices = @transform_4, window_bounds = array<i64: 1, 128, 384>}, {transform_indices = @transform_5, window_bounds = array<i64: 1, 1, 384>}, {transform_indices = @transform_6, window_bounds = array<i64: 1, 128, 128>}, {transform_indices = @transform_7, window_bounds = array<i64: 1, 1, 128>}, {transform_indices = @transform_8, window_bounds = array<i64: 1, 1, 128>}, {transform_indices = @transform_9, window_bounds = array<i64: 1, 1, 128>}, {transform_indices = @transform_10, window_bounds = array<i64: 1, 128, 256>}, {transform_indices = @transform_11, window_bounds = array<i64: 1, 1, 256>}, {transform_indices = @transform_12, window_bounds = array<i64: 1, 256, 128>}, {transform_indices = @transform_13, window_bounds = array<i64: 1, 1, 128>}, {transform_indices = @transform_14, window_bounds = array<i64: 1, 1, 128>}, {transform_indices = @transform_15, window_bounds = array<i64: 1, 1, 128>}, {pipeline_mode = #tpu.pipeline_mode<synchronous>, transform_indices = @transform_16, window_bounds = array<i64: 128, 128>}, {pipeline_mode = #tpu.pipeline_mode<synchronous>, transform_indices = @transform_17, window_bounds = array<i64: 1, 128>}, {pipeline_mode = #tpu.pipeline_mode<synchronous>, transform_indices = @transform_18, window_bounds = array<i64: 128, 128>}, {pipeline_mode = #tpu.pipeline_mode<synchronous>, transform_indices = @transform_19, window_bounds = array<i64: 1, 128>}, {transform_indices = @transform_20, window_bounds = array<i64: 16, 128>}, {transform_indices = @transform_21, window_bounds = array<i64: 16, 128>}]} {
    %c0_i32 = arith.constant 0 : i32
    %0 = arith.cmpi eq, %arg1, %c0_i32 : i32
    %1 = arith.extui %0 : i1 to i32
    %c0_i32_0 = arith.constant 0 : i32
    %2 = arith.cmpi ne, %1, %c0_i32_0 : i32
    scf.if %2 {
      %c0_72 = arith.constant 0 : index
      %c0_73 = arith.constant 0 : index
      %160 = vector.load %arg2[%c0_72, %c0_73] : memref<16x128xf32, #tpu.memory_space<vmem>>, vector<16x128xf32>
      %c0_74 = arith.constant 0 : index
      %c0_75 = arith.constant 0 : index
      %161 = vector.load %arg3[%c0_74, %c0_75] : memref<1x128xf32, #tpu.memory_space<vmem>>, vector<1x128xf32>
      %c0_76 = arith.constant 0 : index
      %c0_77 = arith.constant 0 : index
      %162 = vector.load %arg4[%c0_76, %c0_77] : memref<1x128xf32, #tpu.memory_space<vmem>>, vector<1x128xf32>
      %cst_78 = arith.constant dense<0.000000e+00> : vector<16xf32>
      %163 = vector.multi_reduction <add>, %160, %cst_78 [1] : vector<16x128xf32> to vector<16xf32>
      %164 = vector.shape_cast %163 : vector<16xf32> to vector<16x1xf32>
      %cst_79 = arith.constant 1.280000e+02 : f32
      %165 = vector.broadcast %cst_79 : f32 to vector<16x1xf32>
      %166 = arith.divf %164, %165 : vector<16x1xf32>
      %167 = vector.broadcast %166 : vector<16x1xf32> to vector<16x128xf32>
      %168 = arith.subf %160, %167 : vector<16x128xf32>
      %169 = arith.mulf %168, %168 : vector<16x128xf32>
      %cst_80 = arith.constant dense<0.000000e+00> : vector<16xf32>
      %170 = vector.multi_reduction <add>, %169, %cst_80 [1] : vector<16x128xf32> to vector<16xf32>
      %171 = vector.shape_cast %170 : vector<16xf32> to vector<16x1xf32>
      %cst_81 = arith.constant 1.280000e+02 : f32
      %172 = vector.broadcast %cst_81 : f32 to vector<16x1xf32>
      %173 = arith.divf %171, %172 : vector<16x1xf32>
      %174 = vector.broadcast %166 : vector<16x1xf32> to vector<16x128xf32>
      %175 = arith.subf %160, %174 : vector<16x128xf32>
      %cst_82 = arith.constant 9.99999996E-13 : f32
      %176 = vector.broadcast %cst_82 : f32 to vector<16x1xf32>
      %177 = arith.addf %173, %176 : vector<16x1xf32>
      %178 = math.rsqrt %177 : vector<16x1xf32>
      %179 = vector.broadcast %178 : vector<16x1xf32> to vector<16x128xf32>
      %180 = arith.mulf %175, %179 : vector<16x128xf32>
      %181 = vector.broadcast %161 : vector<1x128xf32> to vector<16x128xf32>
      %182 = arith.mulf %180, %181 : vector<16x128xf32>
      %183 = vector.broadcast %162 : vector<1x128xf32> to vector<16x128xf32>
      %184 = arith.addf %182, %183 : vector<16x128xf32>
      %c0_83 = arith.constant 0 : index
      %c0_84 = arith.constant 0 : index
      %185 = vector.load %arg22[%c0_83, %c0_84] : memref<16x128xf32, #tpu.memory_space<vmem>>, vector<16x128xf32>
      tpu.vector_store %arg22[%c0_83, %c0_84], %184 {strides = array<i32>} : memref<16x128xf32, #tpu.memory_space<vmem>>, vector<16x128xf32>,
    } else {
    }
    %c0 = arith.constant 0 : index
    %c0_1 = arith.constant 0 : index
    %3 = vector.load %arg22[%c0, %c0_1] : memref<16x128xf32, #tpu.memory_space<vmem>>, vector<16x128xf32>
    %4 = arith.truncf %3 : vector<16x128xf32> to vector<16x128xbf16>
    %c0_2 = arith.constant 0 : index
    %c0_3 = arith.constant 0 : index
    %c0_4 = arith.constant 0 : index
    %5 = vector.load %arg6[%c0_2, %c0_3, %c0_4] : memref<1x128x384xbf16, #tpu.memory_space<vmem>>, vector<1x128x384xbf16>
    %6 = vector.shape_cast %5 : vector<1x128x384xbf16> to vector<128x384xbf16>
    %cst = arith.constant dense<0.000000e+00> : vector<16x384xf32>
    %7 = tpu.matmul %4, %6, %cst {dimension_numbers = #tpu.dot_dimension_numbers<[1], [0], [0], [1], [0, 0, 1, 1], [], []>} : vector<16x128xbf16>, vector<128x384xbf16>, vector<16x384xf32> -> vector<16x384xf32>
    %c0_5 = arith.constant 0 : index
    %c0_6 = arith.constant 0 : index
    %c0_7 = arith.constant 0 : index
    %8 = vector.load %arg7[%c0_5, %c0_6, %c0_7] : memref<1x1x384xf32, #tpu.memory_space<vmem>>, vector<1x1x384xf32>
    %9 = vector.shape_cast %8 : vector<1x1x384xf32> to vector<1x384xf32>
    %10 = vector.broadcast %9 : vector<1x384xf32> to vector<16x384xf32>
    %11 = arith.addf %7, %10 : vector<16x384xf32>
    %c0_8 = arith.constant 0 : index
    %c0_9 = arith.constant 0 : index
    %c0_10 = arith.constant 0 : index
    %12 = vector.load %arg5[%c0_8, %c0_9, %c0_10] : memref<1x1x16xf32, #tpu.memory_space<vmem>>, vector<1x1x16xf32>
    %13 = vector.shape_cast %12 : vector<1x1x16xf32> to vector<1x16xf32>
    %c0_11 = arith.constant 0 : index
    %c0_12 = arith.constant 0 : index
    %c0_13 = arith.constant 0 : index
    %14 = vector.load %arg8[%c0_11, %c0_12, %c0_13] : memref<1x128x128xbf16, #tpu.memory_space<vmem>>, vector<1x128x128xbf16>
    %15 = vector.shape_cast %14 : vector<1x128x128xbf16> to vector<128x128xbf16>
    %16 = vector.extract_strided_slice %11 {offsets = [0, 0], sizes = [16, 64], strides = [1, 1]} : vector<16x384xf32> to vector<16x64xf32>
    %17 = vector.extract_strided_slice %11 {offsets = [0, 128], sizes = [16, 64], strides = [1, 1]} : vector<16x384xf32> to vector<16x64xf32>
    %18 = vector.extract_strided_slice %11 {offsets = [0, 256], sizes = [16, 64], strides = [1, 1]} : vector<16x384xf32> to vector<16x64xf32>
    %19 = arith.truncf %16 : vector<16x64xf32> to vector<16x64xbf16>
    %20 = arith.truncf %17 : vector<16x64xf32> to vector<16x64xbf16>
    %cst_14 = arith.constant dense<0.000000e+00> : vector<16x16xf32>
    %21 = tpu.matmul %19, %20, %cst_14 {dimension_numbers = #tpu.dot_dimension_numbers<[1], [1], [0], [0], [0, 0, 1, 0], [], []>} : vector<16x64xbf16>, vector<16x64xbf16>, vector<16x16xf32> -> vector<16x16xf32>
    %cst_15 = arith.constant 1.250000e-01 : f32
    %22 = vector.broadcast %cst_15 : f32 to vector<16x16xf32>
    %23 = arith.mulf %21, %22 : vector<16x16xf32>
    %24 = vector.broadcast %13 : vector<1x16xf32> to vector<16x16xf32>
    %25 = arith.addf %23, %24 : vector<16x16xf32>
    %cst_16 = arith.constant dense<0xFF800000> : vector<16xf32>
    %26 = vector.multi_reduction <maximumf>, %25, %cst_16 [1] : vector<16x16xf32> to vector<16xf32>
    %27 = vector.shape_cast %26 : vector<16xf32> to vector<16x1xf32>
    %28 = vector.broadcast %27 : vector<16x1xf32> to vector<16x16xf32>
    %29 = arith.subf %25, %28 : vector<16x16xf32>
    %30 = math.exp %29 : vector<16x16xf32>
    %cst_17 = arith.constant dense<0.000000e+00> : vector<16xf32>
    %31 = vector.multi_reduction <add>, %30, %cst_17 [1] : vector<16x16xf32> to vector<16xf32>
    %32 = vector.shape_cast %31 : vector<16xf32> to vector<16x1xf32>
    %33 = tpu.reciprocal %32 {approx = true} : vector<16x1xf32> -> vector<16x1xf32>
    %34 = vector.broadcast %33 : vector<16x1xf32> to vector<16x16xf32>
    %35 = arith.mulf %30, %34 : vector<16x16xf32>
    %36 = arith.truncf %35 : vector<16x16xf32> to vector<16x16xbf16>
    %37 = arith.truncf %18 : vector<16x64xf32> to vector<16x64xbf16>
    %cst_18 = arith.constant dense<0.000000e+00> : vector<16x64xf32>
    %38 = tpu.matmul %36, %37, %cst_18 {dimension_numbers = #tpu.dot_dimension_numbers<[1], [0], [0], [1], [0, 0, 1, 1], [], []>} : vector<16x16xbf16>, vector<16x64xbf16>, vector<16x64xf32> -> vector<16x64xf32>
    %39 = arith.truncf %38 : vector<16x64xf32> to vector<16x64xbf16>
    %40 = vector.extract_strided_slice %15 {offsets = [0, 0], sizes = [64, 128], strides = [1, 1]} : vector<128x128xbf16> to vector<64x128xbf16>
    %cst_19 = arith.constant dense<0.000000e+00> : vector<16x128xf32>
    %41 = tpu.matmul %39, %40, %cst_19 {dimension_numbers = #tpu.dot_dimension_numbers<[1], [0], [0], [1], [0, 0, 1, 1], [], []>} : vector<16x64xbf16>, vector<64x128xbf16>, vector<16x128xf32> -> vector<16x128xf32>
    %42 = vector.extract_strided_slice %11 {offsets = [0, 64], sizes = [16, 64], strides = [1, 1]} : vector<16x384xf32> to vector<16x64xf32>
    %43 = vector.extract_strided_slice %11 {offsets = [0, 192], sizes = [16, 64], strides = [1, 1]} : vector<16x384xf32> to vector<16x64xf32>
    %44 = vector.extract_strided_slice %11 {offsets = [0, 320], sizes = [16, 64], strides = [1, 1]} : vector<16x384xf32> to vector<16x64xf32>
    %45 = arith.truncf %42 : vector<16x64xf32> to vector<16x64xbf16>
    %46 = arith.truncf %43 : vector<16x64xf32> to vector<16x64xbf16>
    %cst_20 = arith.constant dense<0.000000e+00> : vector<16x16xf32>
    %47 = tpu.matmul %45, %46, %cst_20 {dimension_numbers = #tpu.dot_dimension_numbers<[1], [1], [0], [0], [0, 0, 1, 0], [], []>} : vector<16x64xbf16>, vector<16x64xbf16>, vector<16x16xf32> -> vector<16x16xf32>
    %cst_21 = arith.constant 1.250000e-01 : f32
    %48 = vector.broadcast %cst_21 : f32 to vector<16x16xf32>
    %49 = arith.mulf %47, %48 : vector<16x16xf32>
    %50 = vector.broadcast %13 : vector<1x16xf32> to vector<16x16xf32>
    %51 = arith.addf %49, %50 : vector<16x16xf32>
    %cst_22 = arith.constant dense<0xFF800000> : vector<16xf32>
    %52 = vector.multi_reduction <maximumf>, %51, %cst_22 [1] : vector<16x16xf32> to vector<16xf32>
    %53 = vector.shape_cast %52 : vector<16xf32> to vector<16x1xf32>
    %54 = vector.broadcast %53 : vector<16x1xf32> to vector<16x16xf32>
    %55 = arith.subf %51, %54 : vector<16x16xf32>
    %56 = math.exp %55 : vector<16x16xf32>
    %cst_23 = arith.constant dense<0.000000e+00> : vector<16xf32>
    %57 = vector.multi_reduction <add>, %56, %cst_23 [1] : vector<16x16xf32> to vector<16xf32>
    %58 = vector.shape_cast %57 : vector<16xf32> to vector<16x1xf32>
    %59 = tpu.reciprocal %58 {approx = true} : vector<16x1xf32> -> vector<16x1xf32>
    %60 = vector.broadcast %59 : vector<16x1xf32> to vector<16x16xf32>
    %61 = arith.mulf %56, %60 : vector<16x16xf32>
    %62 = arith.truncf %61 : vector<16x16xf32> to vector<16x16xbf16>
    %63 = arith.truncf %44 : vector<16x64xf32> to vector<16x64xbf16>
    %cst_24 = arith.constant dense<0.000000e+00> : vector<16x64xf32>
    %64 = tpu.matmul %62, %63, %cst_24 {dimension_numbers = #tpu.dot_dimension_numbers<[1], [0], [0], [1], [0, 0, 1, 1], [], []>} : vector<16x16xbf16>, vector<16x64xbf16>, vector<16x64xf32> -> vector<16x64xf32>
    %65 = arith.truncf %64 : vector<16x64xf32> to vector<16x64xbf16>
    %66 = vector.extract_strided_slice %15 {offsets = [64, 0], sizes = [64, 128], strides = [1, 1]} : vector<128x128xbf16> to vector<64x128xbf16>
    %cst_25 = arith.constant dense<0.000000e+00> : vector<16x128xf32>
    %67 = tpu.matmul %65, %66, %cst_25 {dimension_numbers = #tpu.dot_dimension_numbers<[1], [0], [0], [1], [0, 0, 1, 1], [], []>} : vector<16x64xbf16>, vector<64x128xbf16>, vector<16x128xf32> -> vector<16x128xf32>
    %68 = arith.addf %41, %67 : vector<16x128xf32>
    %c0_26 = arith.constant 0 : index
    %c0_27 = arith.constant 0 : index
    %c0_28 = arith.constant 0 : index
    %69 = vector.load %arg9[%c0_26, %c0_27, %c0_28] : memref<1x1x128xf32, #tpu.memory_space<vmem>>, vector<1x1x128xf32>
    %70 = vector.shape_cast %69 : vector<1x1x128xf32> to vector<1x128xf32>
    %71 = vector.broadcast %70 : vector<1x128xf32> to vector<16x128xf32>
    %72 = arith.addf %68, %71 : vector<16x128xf32>
    %73 = arith.addf %3, %72 : vector<16x128xf32>
    %c0_29 = arith.constant 0 : index
    %c0_30 = arith.constant 0 : index
    %c0_31 = arith.constant 0 : index
    %74 = vector.load %arg10[%c0_29, %c0_30, %c0_31] : memref<1x1x128xf32, #tpu.memory_space<vmem>>, vector<1x1x128xf32>
    %75 = vector.shape_cast %74 : vector<1x1x128xf32> to vector<1x128xf32>
    %c0_32 = arith.constant 0 : index
    %c0_33 = arith.constant 0 : index
    %c0_34 = arith.constant 0 : index
    %76 = vector.load %arg11[%c0_32, %c0_33, %c0_34] : memref<1x1x128xf32, #tpu.memory_space<vmem>>, vector<1x1x128xf32>
    %77 = vector.shape_cast %76 : vector<1x1x128xf32> to vector<1x128xf32>
    %cst_35 = arith.constant dense<0.000000e+00> : vector<16xf32>
    %78 = vector.multi_reduction <add>, %73, %cst_35 [1] : vector<16x128xf32> to vector<16xf32>
    %79 = vector.shape_cast %78 : vector<16xf32> to vector<16x1xf32>
    %cst_36 = arith.constant 1.280000e+02 : f32
    %80 = vector.broadcast %cst_36 : f32 to vector<16x1xf32>
    %81 = arith.divf %79, %80 : vector<16x1xf32>
    %82 = vector.broadcast %81 : vector<16x1xf32> to vector<16x128xf32>
    %83 = arith.subf %73, %82 : vector<16x128xf32>
    %84 = arith.mulf %83, %83 : vector<16x128xf32>
    %cst_37 = arith.constant dense<0.000000e+00> : vector<16xf32>
    %85 = vector.multi_reduction <add>, %84, %cst_37 [1] : vector<16x128xf32> to vector<16xf32>
    %86 = vector.shape_cast %85 : vector<16xf32> to vector<16x1xf32>
    %cst_38 = arith.constant 1.280000e+02 : f32
    %87 = vector.broadcast %cst_38 : f32 to vector<16x1xf32>
    %88 = arith.divf %86, %87 : vector<16x1xf32>
    %89 = vector.broadcast %81 : vector<16x1xf32> to vector<16x128xf32>
    %90 = arith.subf %73, %89 : vector<16x128xf32>
    %cst_39 = arith.constant 9.99999996E-13 : f32
    %91 = vector.broadcast %cst_39 : f32 to vector<16x1xf32>
    %92 = arith.addf %88, %91 : vector<16x1xf32>
    %93 = math.rsqrt %92 : vector<16x1xf32>
    %94 = vector.broadcast %93 : vector<16x1xf32> to vector<16x128xf32>
    %95 = arith.mulf %90, %94 : vector<16x128xf32>
    %96 = vector.broadcast %75 : vector<1x128xf32> to vector<16x128xf32>
    %97 = arith.mulf %95, %96 : vector<16x128xf32>
    %98 = vector.broadcast %77 : vector<1x128xf32> to vector<16x128xf32>
    %99 = arith.addf %97, %98 : vector<16x128xf32>
    %100 = arith.truncf %99 : vector<16x128xf32> to vector<16x128xbf16>
    %c0_40 = arith.constant 0 : index
    %c0_41 = arith.constant 0 : index
    %c0_42 = arith.constant 0 : index
    %101 = vector.load %arg12[%c0_40, %c0_41, %c0_42] : memref<1x128x256xbf16, #tpu.memory_space<vmem>>, vector<1x128x256xbf16>
    %102 = vector.shape_cast %101 : vector<1x128x256xbf16> to vector<128x256xbf16>
    %cst_43 = arith.constant dense<0.000000e+00> : vector<16x256xf32>
    %103 = tpu.matmul %100, %102, %cst_43 {dimension_numbers = #tpu.dot_dimension_numbers<[1], [0], [0], [1], [0, 0, 1, 1], [], []>} : vector<16x128xbf16>, vector<128x256xbf16>, vector<16x256xf32> -> vector<16x256xf32>
    %c0_44 = arith.constant 0 : index
    %c0_45 = arith.constant 0 : index
    %c0_46 = arith.constant 0 : index
    %104 = vector.load %arg13[%c0_44, %c0_45, %c0_46] : memref<1x1x256xf32, #tpu.memory_space<vmem>>, vector<1x1x256xf32>
    %105 = vector.shape_cast %104 : vector<1x1x256xf32> to vector<1x256xf32>
    %106 = vector.broadcast %105 : vector<1x256xf32> to vector<16x256xf32>
    %107 = arith.addf %103, %106 : vector<16x256xf32>
    %108 = arith.mulf %107, %107 : vector<16x256xf32>
    %109 = arith.mulf %107, %108 : vector<16x256xf32>
    %cst_47 = arith.constant 4.471500e-02 : f32
    %110 = vector.broadcast %cst_47 : f32 to vector<16x256xf32>
    %111 = arith.mulf %110, %109 : vector<16x256xf32>
    %112 = arith.addf %107, %111 : vector<16x256xf32>
    %cst_48 = arith.constant 0.797884583 : f32
    %113 = vector.broadcast %cst_48 : f32 to vector<16x256xf32>
    %114 = arith.mulf %113, %112 : vector<16x256xf32>
    %115 = math.tanh %114 : vector<16x256xf32>
    %cst_49 = arith.constant 1.000000e+00 : f32
    %116 = vector.broadcast %cst_49 : f32 to vector<16x256xf32>
    %117 = arith.addf %116, %115 : vector<16x256xf32>
    %cst_50 = arith.constant 5.000000e-01 : f32
    %118 = vector.broadcast %cst_50 : f32 to vector<16x256xf32>
    %119 = arith.mulf %118, %117 : vector<16x256xf32>
    %120 = arith.mulf %107, %119 : vector<16x256xf32>
    %121 = arith.truncf %120 : vector<16x256xf32> to vector<16x256xbf16>
    %c0_51 = arith.constant 0 : index
    %c0_52 = arith.constant 0 : index
    %c0_53 = arith.constant 0 : index
    %122 = vector.load %arg14[%c0_51, %c0_52, %c0_53] : memref<1x256x128xbf16, #tpu.memory_space<vmem>>, vector<1x256x128xbf16>
    %123 = vector.shape_cast %122 : vector<1x256x128xbf16> to vector<256x128xbf16>
    %cst_54 = arith.constant dense<0.000000e+00> : vector<16x128xf32>
    %124 = tpu.matmul %121, %123, %cst_54 {dimension_numbers = #tpu.dot_dimension_numbers<[1], [0], [0], [1], [0, 0, 1, 1], [], []>} : vector<16x256xbf16>, vector<256x128xbf16>, vector<16x128xf32> -> vector<16x128xf32>
    %c0_55 = arith.constant 0 : index
    %c0_56 = arith.constant 0 : index
    %c0_57 = arith.constant 0 : index
    %125 = vector.load %arg15[%c0_55, %c0_56, %c0_57] : memref<1x1x128xf32, #tpu.memory_space<vmem>>, vector<1x1x128xf32>
    %126 = vector.shape_cast %125 : vector<1x1x128xf32> to vector<1x128xf32>
    %127 = vector.broadcast %126 : vector<1x128xf32> to vector<16x128xf32>
    %128 = arith.addf %124, %127 : vector<16x128xf32>
    %129 = arith.addf %99, %128 : vector<16x128xf32>
    %c0_58 = arith.constant 0 : index
    %c0_59 = arith.constant 0 : index
    %c0_60 = arith.constant 0 : index
    %130 = vector.load %arg16[%c0_58, %c0_59, %c0_60] : memref<1x1x128xf32, #tpu.memory_space<vmem>>, vector<1x1x128xf32>
    %131 = vector.shape_cast %130 : vector<1x1x128xf32> to vector<1x128xf32>
    %c0_61 = arith.constant 0 : index
    %c0_62 = arith.constant 0 : index
    %c0_63 = arith.constant 0 : index
    %132 = vector.load %arg17[%c0_61, %c0_62, %c0_63] : memref<1x1x128xf32, #tpu.memory_space<vmem>>, vector<1x1x128xf32>
    %133 = vector.shape_cast %132 : vector<1x1x128xf32> to vector<1x128xf32>
    %cst_64 = arith.constant dense<0.000000e+00> : vector<16xf32>
    %134 = vector.multi_reduction <add>, %129, %cst_64 [1] : vector<16x128xf32> to vector<16xf32>
    %135 = vector.shape_cast %134 : vector<16xf32> to vector<16x1xf32>
    %cst_65 = arith.constant 1.280000e+02 : f32
    %136 = vector.broadcast %cst_65 : f32 to vector<16x1xf32>
    %137 = arith.divf %135, %136 : vector<16x1xf32>
    %138 = vector.broadcast %137 : vector<16x1xf32> to vector<16x128xf32>
    %139 = arith.subf %129, %138 : vector<16x128xf32>
    %140 = arith.mulf %139, %139 : vector<16x128xf32>
    %cst_66 = arith.constant dense<0.000000e+00> : vector<16xf32>
    %141 = vector.multi_reduction <add>, %140, %cst_66 [1] : vector<16x128xf32> to vector<16xf32>
    %142 = vector.shape_cast %141 : vector<16xf32> to vector<16x1xf32>
    %cst_67 = arith.constant 1.280000e+02 : f32
    %143 = vector.broadcast %cst_67 : f32 to vector<16x1xf32>
    %144 = arith.divf %142, %143 : vector<16x1xf32>
    %145 = vector.broadcast %137 : vector<16x1xf32> to vector<16x128xf32>
    %146 = arith.subf %129, %145 : vector<16x128xf32>
    %cst_68 = arith.constant 9.99999996E-13 : f32
    %147 = vector.broadcast %cst_68 : f32 to vector<16x1xf32>
    %148 = arith.addf %144, %147 : vector<16x1xf32>
    %149 = math.rsqrt %148 : vector<16x1xf32>
    %150 = vector.broadcast %149 : vector<16x1xf32> to vector<16x128xf32>
    %151 = arith.mulf %146, %150 : vector<16x128xf32>
    %152 = vector.broadcast %131 : vector<1x128xf32> to vector<16x128xf32>
    %153 = arith.mulf %151, %152 : vector<16x128xf32>
    %154 = vector.broadcast %133 : vector<1x128xf32> to vector<16x128xf32>
    %155 = arith.addf %153, %154 : vector<16x128xf32>
    %c0_69 = arith.constant 0 : index
    %c0_70 = arith.constant 0 : index
    %156 = vector.load %arg22[%c0_69, %c0_70] : memref<16x128xf32, #tpu.memory_space<vmem>>, vector<16x128xf32>
    tpu.vector_store %arg22[%c0_69, %c0_70], %155 {strides = array<i32>} : memref<16x128xf32, #tpu.memory_space<vmem>>, vector<16x128xf32>,
    %c1_i32 = arith.constant 1 : i32
    %157 = arith.cmpi eq, %arg1, %c1_i32 : i32
    %158 = arith.extui %157 : i1 to i32
    %c0_i32_71 = arith.constant 0 : i32
    %159 = arith.cmpi ne, %158, %c0_i32_71 : i32
    scf.if %159 {
      %160 = arith.truncf %155 : vector<16x128xf32> to vector<16x128xbf16>
      %c0_72 = arith.constant 0 : index
      %c0_73 = arith.constant 0 : index
      %161 = vector.load %arg18[%c0_72, %c0_73] : memref<128x128xbf16, #tpu.memory_space<vmem>>, vector<128x128xbf16>
      %cst_74 = arith.constant dense<0.000000e+00> : vector<16x128xf32>
      %162 = tpu.matmul %160, %161, %cst_74 {dimension_numbers = #tpu.dot_dimension_numbers<[1], [0], [0], [1], [0, 0, 1, 1], [], []>} : vector<16x128xbf16>, vector<128x128xbf16>, vector<16x128xf32> -> vector<16x128xf32>
      %c0_75 = arith.constant 0 : index
      %c0_76 = arith.constant 0 : index
      %163 = vector.load %arg19[%c0_75, %c0_76] : memref<1x128xf32, #tpu.memory_space<vmem>>, vector<1x128xf32>
      %164 = vector.broadcast %163 : vector<1x128xf32> to vector<16x128xf32>
      %165 = arith.addf %162, %164 : vector<16x128xf32>
      %166 = math.tanh %165 : vector<16x128xf32>
      %167 = arith.truncf %166 : vector<16x128xf32> to vector<16x128xbf16>
      %c0_77 = arith.constant 0 : index
      %c0_78 = arith.constant 0 : index
      %168 = vector.load %arg20[%c0_77, %c0_78] : memref<128x128xbf16, #tpu.memory_space<vmem>>, vector<128x128xbf16>
      %cst_79 = arith.constant dense<0.000000e+00> : vector<16x128xf32>
      %169 = tpu.matmul %167, %168, %cst_79 {dimension_numbers = #tpu.dot_dimension_numbers<[1], [0], [0], [1], [0, 0, 1, 1], [], []>} : vector<16x128xbf16>, vector<128x128xbf16>, vector<16x128xf32> -> vector<16x128xf32>
      %c0_80 = arith.constant 0 : index
      %c0_81 = arith.constant 0 : index
      %170 = vector.load %arg21[%c0_80, %c0_81] : memref<1x128xf32, #tpu.memory_space<vmem>>, vector<1x128xf32>
      %171 = vector.broadcast %170 : vector<1x128xf32> to vector<16x128xf32>
      %172 = arith.addf %169, %171 : vector<16x128xf32>
      %c0_82 = arith.constant 0 : index
      %c0_83 = arith.constant 0 : index
      %173 = vector.load %arg23[%c0_82, %c0_83] : memref<16x128xf32, #tpu.memory_space<vmem>>, vector<16x128xf32>
      tpu.vector_store %arg23[%c0_82, %c0_83], %172 {strides = array<i32>} : memref<16x128xf32, #tpu.memory_space<vmem>>, vector<16x128xf32>,
    } else {
    }
    return
  }
  func.func @transform_0(%arg0: i32, %arg1: i32) -> (i32, i32) {
    %c0_i32 = arith.constant 0 : i32
    %c0_i32_0 = arith.constant 0 : i32
    return %arg0, %c0_i32 : i32, i32
  }
  func.func @transform_1(%arg0: i32, %arg1: i32) -> (i32, i32) {
    %c0_i32 = arith.constant 0 : i32
    %c0_i32_0 = arith.constant 0 : i32
    %c0_i32_1 = arith.constant 0 : i32
    return %c0_i32, %c0_i32_0 : i32, i32
  }
  func.func @transform_2(%arg0: i32, %arg1: i32) -> (i32, i32) {
    %c0_i32 = arith.constant 0 : i32
    %c0_i32_0 = arith.constant 0 : i32
    %c0_i32_1 = arith.constant 0 : i32
    return %c0_i32, %c0_i32_0 : i32, i32
  }
  func.func @transform_3(%arg0: i32, %arg1: i32) -> (i32, i32, i32) {
    %c0_i32 = arith.constant 0 : i32
    %c0_i32_0 = arith.constant 0 : i32
    %c0_i32_1 = arith.constant 0 : i32
    return %arg0, %c0_i32, %c0_i32_0 : i32, i32, i32
  }
  func.func @transform_4(%arg0: i32, %arg1: i32) -> (i32, i32, i32) {
    %c0_i32 = arith.constant 0 : i32
    %c0_i32_0 = arith.constant 0 : i32
    %c0_i32_1 = arith.constant 0 : i32
    return %arg1, %c0_i32, %c0_i32_0 : i32, i32, i32
  }
  func.func @transform_5(%arg0: i32, %arg1: i32) -> (i32, i32, i32) {
    %c0_i32 = arith.constant 0 : i32
    %c0_i32_0 = arith.constant 0 : i32
    %c0_i32_1 = arith.constant 0 : i32
    return %arg1, %c0_i32, %c0_i32_0 : i32, i32, i32
  }
  func.func @transform_6(%arg0: i32, %arg1: i32) -> (i32, i32, i32) {
    %c0_i32 = arith.constant 0 : i32
    %c0_i32_0 = arith.constant 0 : i32
    %c0_i32_1 = arith.constant 0 : i32
    return %arg1, %c0_i32, %c0_i32_0 : i32, i32, i32
  }
  func.func @transform_7(%arg0: i32, %arg1: i32) -> (i32, i32, i32) {
    %c0_i32 = arith.constant 0 : i32
    %c0_i32_0 = arith.constant 0 : i32
    %c0_i32_1 = arith.constant 0 : i32
    return %arg1, %c0_i32, %c0_i32_0 : i32, i32, i32
  }
  func.func @transform_8(%arg0: i32, %arg1: i32) -> (i32, i32, i32) {
    %c0_i32 = arith.constant 0 : i32
    %c0_i32_0 = arith.constant 0 : i32
    %c0_i32_1 = arith.constant 0 : i32
    return %arg1, %c0_i32, %c0_i32_0 : i32, i32, i32
  }
  func.func @transform_9(%arg0: i32, %arg1: i32) -> (i32, i32, i32) {
    %c0_i32 = arith.constant 0 : i32
    %c0_i32_0 = arith.constant 0 : i32
    %c0_i32_1 = arith.constant 0 : i32
    return %arg1, %c0_i32, %c0_i32_0 : i32, i32, i32
  }
  func.func @transform_10(%arg0: i32, %arg1: i32) -> (i32, i32, i32) {
    %c0_i32 = arith.constant 0 : i32
    %c0_i32_0 = arith.constant 0 : i32
    %c0_i32_1 = arith.constant 0 : i32
    return %arg1, %c0_i32, %c0_i32_0 : i32, i32, i32
  }
  func.func @transform_11(%arg0: i32, %arg1: i32) -> (i32, i32, i32) {
    %c0_i32 = arith.constant 0 : i32
    %c0_i32_0 = arith.constant 0 : i32
    %c0_i32_1 = arith.constant 0 : i32
    return %arg1, %c0_i32, %c0_i32_0 : i32, i32, i32
  }
  func.func @transform_12(%arg0: i32, %arg1: i32) -> (i32, i32, i32) {
    %c0_i32 = arith.constant 0 : i32
    %c0_i32_0 = arith.constant 0 : i32
    %c0_i32_1 = arith.constant 0 : i32
    return %arg1, %c0_i32, %c0_i32_0 : i32, i32, i32
  }
  func.func @transform_13(%arg0: i32, %arg1: i32) -> (i32, i32, i32) {
    %c0_i32 = arith.constant 0 : i32
    %c0_i32_0 = arith.constant 0 : i32
    %c0_i32_1 = arith.constant 0 : i32
    return %arg1, %c0_i32, %c0_i32_0 : i32, i32, i32
  }
  func.func @transform_14(%arg0: i32, %arg1: i32) -> (i32, i32, i32) {
    %c0_i32 = arith.constant 0 : i32
    %c0_i32_0 = arith.constant 0 : i32
    %c0_i32_1 = arith.constant 0 : i32
    return %arg1, %c0_i32, %c0_i32_0 : i32, i32, i32
  }
  func.func @transform_15(%arg0: i32, %arg1: i32) -> (i32, i32, i32) {
    %c0_i32 = arith.constant 0 : i32
    %c0_i32_0 = arith.constant 0 : i32
    %c0_i32_1 = arith.constant 0 : i32
    return %arg1, %c0_i32, %c0_i32_0 : i32, i32, i32
  }
  func.func @transform_16(%arg0: i32, %arg1: i32) -> (i32, i32) {
    %c0_i32 = arith.constant 0 : i32
    %c0_i32_0 = arith.constant 0 : i32
    %c0_i32_1 = arith.constant 0 : i32
    return %c0_i32, %c0_i32_0 : i32, i32
  }
  func.func @transform_17(%arg0: i32, %arg1: i32) -> (i32, i32) {
    %c0_i32 = arith.constant 0 : i32
    %c0_i32_0 = arith.constant 0 : i32
    %c0_i32_1 = arith.constant 0 : i32
    return %c0_i32, %c0_i32_0 : i32, i32
  }
  func.func @transform_18(%arg0: i32, %arg1: i32) -> (i32, i32) {
    %c0_i32 = arith.constant 0 : i32
    %c0_i32_0 = arith.constant 0 : i32
    %c0_i32_1 = arith.constant 0 : i32
    return %c0_i32, %c0_i32_0 : i32, i32
  }
  func.func @transform_19(%arg0: i32, %arg1: i32) -> (i32, i32) {
    %c0_i32 = arith.constant 0 : i32
    %c0_i32_0 = arith.constant 0 : i32
    %c0_i32_1 = arith.constant 0 : i32
    return %c0_i32, %c0_i32_0 : i32, i32
  }
  func.func @transform_20(%arg0: i32, %arg1: i32) -> (i32, i32) {
    %c0_i32 = arith.constant 0 : i32
    %c0_i32_0 = arith.constant 0 : i32
    return %arg0, %c0_i32 : i32, i32
  }
  func.func @transform_21(%arg0: i32, %arg1: i32) -> (i32, i32) {
    %c0_i32 = arith.constant 0 : i32
    %c0_i32_0 = arith.constant 0 : i32
    return %arg0, %c0_i32 : i32, i32
  }
}

</mosaic_0001>

<bundles_post_ra>
// kernel: _forward_core.1
= control target key start
LH: loop header
LB: loop body
LE: loop exit
PB: predicated region body
PF: predicated region fallthrough
CT: control target
= control target key end

     0   :  { %s3918_s0 = inlined_call_operand.vmem [shape: f32[32,128], index: 0, kind: input, shape index: {}]   ;;  %s3919_s1 = inlined_call_operand.vmem [shape: f32[1,128], index: 1, kind: input, shape index: {}]   ;;  %s3920_s2 = inlined_call_operand.vmem [shape: f32[1,128], index: 2, kind: input, shape index: {}]   ;;  %s3921_s3 = inlined_call_operand.vmem [shape: f32[2,1,16], index: 3, kind: input, shape index: {}]   ;;  %s3922_s4 = inlined_call_operand.hbm [shape: bf16[2,128,384], index: 4, kind: input, shape index: {}]   ;;  %s3923_s5 = inlined_call_operand.vmem [shape: f32[2,1,384], index: 5, kind: input, shape index: {}]   ;;  %s3924_s6 = inlined_call_operand.hbm [shape: bf16[2,128,128], index: 6, kind: input, shape index: {}]   ;;  %s3925_s7 = inlined_call_operand.vmem [shape: f32[2,1,128], index: 7, kind: input, shape index: {}]   ;;  %s3926_s8 = inlined_call_operand.vmem [shape: f32[2,1,128], index: 8, kind: input, shape index: {}]   ;;  %s3927_s9 = inlined_call_operand.vmem [shape: f32[2,1,128], index: 9, kind: input, shape index: {}]   ;;  %s3928_s10 = inlined_call_operand.vmem [shape: bf16[2,128,256], index: 10, kind: input, shape index: {}]   ;;  %s3929_s11 = inlined_call_operand.vmem [shape: f32[2,1,256], index: 11, kind: input, shape index: {}]   ;;  %s3930_s12 = inlined_call_operand.hbm [shape: bf16[2,256,128], index: 12, kind: input, shape index: {}]   ;;  %s3931_s13 = inlined_call_operand.vmem [shape: f32[2,1,128], index: 13, kind: input, shape index: {}]   ;;  %s3932_s14 = inlined_call_operand.vmem [shape: f32[2,1,128], index: 14, kind: input, shape index: {}]   ;;  %s3933_s15 = inlined_call_operand.vmem [shape: f32[2,1,128], index: 15, kind: input, shape index: {}]   ;;  %s3934_s16 = inlined_call_operand.vmem [shape: bf16[128,128], index: 16, kind: input, shape index: {}]   ;;  %s3935_s17 = inlined_call_operand.vmem [shape: f32[1,128], index: 17, kind: input, shape index: {}]   ;;  %s3936_s18 = inlined_call_operand.vmem [shape: bf16[128,128], index: 18, kind: input, shape index: {}]   ;;  %s3937_s19 = inlined_call_operand.vmem [shape: f32[1,128], index: 19, kind: input, shape index: {}]   ;;  %s3938_s20 = inlined_call_operand.hbm [shape: f32[32,128], index: 20, kind: output, shape index: {0}]   ;;  %s3939_s21 = inlined_call_operand.vmem [shape: f32[32,128], index: 21, kind: output, shape index: {1}]  }
   0x1   :  { %3959 = sst [smem:[#allocation27_spill]] %s3918_s0 }
   0x2   :  { %3960 = sst [smem:[#allocation28_spill]] %s3919_s1 }
   0x3   :  { %3961 = sst [smem:[#allocation29_spill]] %s3920_s2 }
   0x4   :  { %3962 = sst [smem:[#allocation30_spill]] %s3921_s3 }
   0x5   :  { %3963 = sst [smem:[#allocation31_spill]] %s3922_s4 }
   0x6   :  { %3964 = sst [smem:[#allocation32_spill]] %s3923_s5 }
   0x7   :  { %3965 = sst [smem:[#allocation33_spill]] %s3924_s6 }
   0x8   :  { %3966 = sst [smem:[#allocation34_spill]] %s3925_s7 }
   0x9   :  { %3967 = sst [smem:[#allocation35_spill]] %s3926_s8 }
   0xa   :  { %3968 = sst [smem:[#allocation36_spill]] %s3927_s9 }
   0xb   :  { %3969 = sst [smem:[#allocation37_spill]] %s3928_s10 }
   0xc   :  { %3970 = sst [smem:[#allocation38_spill]] %s3929_s11 }
   0xd   :  { %3971 = sst [smem:[#allocation39_spill]] %s3930_s12 }
   0xe   :  { %3972 = sst [smem:[#allocation40_spill]] %s3931_s13 }
   0xf   :  { %3973 = sst [smem:[#allocation41_spill]] %s3932_s14 }
  0x10   :  { %3974 = sst [smem:[#allocation42_spill]] %s3933_s15 }
  0x11   :  { %3975 = sst [smem:[#allocation43_spill]] %s3934_s16 }
  0x12   :  { %3976 = sst [smem:[#allocation44_spill]] %s3935_s17 }
  0x13   :  { %3977 = sst [smem:[#allocation45_spill]] %s3936_s18 }
  0x14   :  { %3978 = sst [smem:[#allocation46_spill]] %s3937_s19 }
  0x15   :  { %3979 = sst [smem:[#allocation47_spill]] %s3938_s20 }
  0x16   :  { %3980 = sst [smem:[#allocation48_spill]] %s3939_s21 }
  0x17   :  { %27 = vsyncpa [#allocation3], 0 }
  0x18   :  { %29 = vsyncpa [#allocation3 + $0x1], 0 }
  0x19   :  { %30 = vsyncpa [#allocation6], 0 }
  0x1a   :  { %32 = vsyncpa [#allocation6 + $0x1], 0 }
  0x1b   :  { %33 = vsyncpa [#allocation4], 0 }
  0x1c   :  { %35 = vsyncpa [#allocation4 + $0x1], 0  ;;  %s3357_s2 = smov 0   ;;  %s3359_s25 = smov 0  }
  0x1d   :  { %s3361_s26 = smov 0   ;;  %s3363_s27 = smov 0  }
  0x1e   :  { %s3365_s3 = smov 0   ;;  %s3367_s28 = smov 0  }
  0x1f   :  { %s3369_s29 = smov 0   ;;  %s3371_s0 = smov 0  }
  0x20   :  { %s3373_s4 = smov 0   ;;  %s3375_s30 = smov 0  }
  0x21   :  { %s3377_s5 = smov 0  }
  0x22 LB: > { %3981 = sst [smem:[#allocation12_spill]] %s3196_s2  ;;  %s3411_s22 = sadd.s32 4294967295, %s3236_s5   ;;  %s3236_s5 = sphi %s3377_s5, %s41_s5   ;;  %s3232_s30 = sphi %s3375_s30, %s4052_s30   ;;  %s3228_s4 = sphi %s3373_s4, %s4051_s4   ;;  %s3224_s0 = sphi %s3371_s0, %s4050_s0   ;;  %s3220_s29 = sphi %s3369_s29, %s4049_s29   ;;  %s3216_s28 = sphi %s3367_s28, %s4048_s28   ;;  %s3212_s3 = sphi %s3365_s3, %s4047_s3   ;;  %s3208_s27 = sphi %s3363_s27, %s4046_s27   ;;  %s3204_s26 = sphi %s3361_s26, %s4045_s26   ;;  %s3200_s25 = sphi %s3359_s25, %s4044_s25   ;;  %s3196_s2 = sphi %s3357_s2, %s4043_s2  }
  0x23   : > { %3982 = sst [smem:[#allocation13_spill]] %s3200_s25  ;;  %s2402_s23 = sadd.s32 4294967294, %s3236_s5  }
  0x24   : > { %3983 = sst [smem:[#allocation14_spill]] %s3204_s26  ;;  %s50_s1 = sadd.s32 1, %s3228_s4 }
  0x25   : > { %3984 = sst [smem:[#allocation15_spill]] %s3212_s3  ;;  %s53_s24 = sadd.s32 1, %s3232_s30 }
  0x26   : > { %3985 = sst [smem:[#allocation16_spill]] %s3216_s28  ;;  %p51_p0 = scmp.ge.s32.totalorder %s50_s1, 2 }
  0x27   : > { %3986 = sst [smem:[#allocation17_spill]] %s3224_s0  ;;  %s154_s20 = sadd.s32 1, %s3216_s28 }
  0x28   : > { %3987 = sst [smem:[#allocation18_spill]] %s3228_s4  ;;  %p161_p1 = scmp.ne.s32.totalorder %s3216_s28, %s3212_s3 }
  0x29   : > { %3988 = sst [smem:[#allocation19_spill]] %s3232_s30  ;;  %p162_p2 = scmp.eq.s32.totalorder %s3236_s5, 0 }
  0x2a   : > { %3989 = sst [smem:[#allocation20_spill]] %s3236_s5  ;;  %s4054_s1 = smov (%p51_p0, %s50_s1), 0 }
  0x2b   : > { %3990 = sst [smem:[#allocation21_spill]] %s4054_s1  ;;  %s4056_s24 = smov (!%p51_p0, %s53_s24), %s3232_s30 }
  0x2c   : > { %s151_s19 = ssub.s32 %s3228_s4, %s4054_s1  ;;  %p3425_p3 = por %p162_p2, %p161_p1 }
  0x2d   : > { %p55_p4 = scmp.ge.s32.totalorder %s4056_s24, 2  ;;  %p152_p5 = scmp.eq.s32.totalorder %s151_s19, 0 }
  0x2e   : > { %p167_p6 = scmp.ne.s32.totalorder %s3212_s3, %s3208_s27  ;;  %p168_p7 = scmp.eq.s32.totalorder %s3411_s22, 0 }
  0x2f   : > { %s4058_s24 = smov (%p55_p4, %s4056_s24), 0  ;;  %s550_s15 = sadd.s32 1, %s3204_s26 }
  0x30   : > { %3992 = sst [smem:[#allocation22_spill]] %s4058_s24  ;;  %p3436_p8 = por %p168_p7, %p167_p6 }
  0x31   : > { %s3434_s18 = scalar_select %p152_p5, %s3216_s28, %s154_s20  }
  0x32   : > { %s547_s16 = ssub.s32 %s3232_s30, %s4058_s24  ;;  %p560_p10 = scmp.ne.s32.totalorder %s3204_s26, %s3200_s25 }
  0x33   : > { %3993 = sst [smem:[#allocation23_spill]] %s3434_s18  ;;  %p548_p9 = scmp.eq.s32.totalorder %s547_s16, 0 }
  0x34   : > { %p561_p11 = scmp.eq.s32.totalorder %s3411_s22, 3  ;;  %p566_p13 = scmp.ne.s32.totalorder %s3200_s25, %s3196_s2 }
  0x35   : > { %s3447_s19 = scalar_select %p548_p9, %s3204_s26, %s550_s15  }
  0x36   : > { %p3449_p12 = por %p561_p11, %p560_p10  ;;  %p567_p0 = scmp.eq.s32.totalorder %s2402_s23, 3 }
  0x37   : > { %3995 = sst [smem:[#allocation24_spill]] %s3447_s19  ;;  %p2866_p1 = scmp.lt.s32.totalorder %s3236_s5, 4 }
  0x38   : > { %s3996_s27 = scalar_select %p3449_p12, 1, 0 }
  0x39   : > { %s3457_s20 = sand.u32 1, %s3216_s28   ;;  %p3459_p2 = por %p567_p0, %p566_p13 }
  0x3a   : > { %3997 = sst [smem:[#allocation25_spill]] %s3996_s27  ;;  %s675_s16 = sand.u32 1, %s3236_s5  }
  0x3b   : > { %s3998_s18 = scalar_select %p3459_p2, 1, 0 }
  0x3c   : > { %p3466_p4 = pnand %p2866_p1, %p3425_p3  ;;  %s2406_s24 = sshll.u32 %s3457_s20, 6 }
  0x3d   : > { %3999 = sst [smem:[#allocation26_spill]] %s3998_s18  ;;  %s2756_s23 = sshll.u32 %s3228_s4, 6 }
  0x3e   : > { %s4001_s6 = sld [smem:[#allocation33_spill]]  ;;  %s679_s26 = scalar_lea.vmem [#allocation5], %s2406_s24 }
  0x3f   : > { %s687_s2 = sshll.u32 %s679_s26, 4  ;;  %p2412_p5 = scmp.ge.s32.totalorder %s3236_s5, 1  ;;  %s688_s2 = int_to_ptr.vmem [resolvable:$true] %s687_s2 }
  0x40   : > { %s3476_s17 = scalar_lea.sflag [#allocation6], %s675_s16  ;;  %s3238_s18 = smov 64  }
  0x41   : > { %s3239_s14 = smov 4   ;;  %p768_p3 = scmp.lt.s32.totalorder %s3236_s5, 5 }
  0x42   : > { %s2840_s26 = smul.u32 192, %s3457_s20  ;;  %s3240_s5 = smov 192  }
  0x43   : > { %p3482_p6 = pnand %p2412_p5, %p768_p3  ;;  %s2841_s30 = smul.u32 192, %s3228_s4 }
  0x44   : > { %s684_s19 = scalar_lea.hbm %s4001_s6, %s2756_s23  ;;  %s4003_s23 = sld [smem:[#allocation31_spill]] }
  0x45   : > { %s685_s27 = sshll.u32 %s684_s19, 4  ;;  %s650_s16 = scalar_lea.vmem [#allocation2], %s2840_s26  ;;  %s686_s27 = int_to_ptr.hbm [resolvable:$true] %s685_s27 }
  0x46   : > { %2858 = dma.hbm_to_vmem [thread:$0]  (!%p3466_p4), %s686_s27, 1024, %s688_s2, %s3476_s17, %s3238_s18, %s3238_s18, %s3239_s14  }
  0x47   : > { %s658_s13 = sshll.u32 %s650_s16, 4  ;;  %s2409_s2 = sshll.u32 %s3457_s20, 7  ;;  %s659_s13 = int_to_ptr.vmem [resolvable:$true] %s658_s13 }
  0x48   : > { %s647_s27 = scalar_lea.sflag [#allocation3], %s3457_s20  ;;  %s3241_s10 = smov 12  }
  0x49   : > { %s2757_s9 = sshll.u32 %s3228_s4, 7  ;;  %s4004_s12 = sld [smem:[#allocation39_spill]] }
  0x4a   : > { %s655_s6 = scalar_lea.hbm %s4003_s23, %s2841_s30  ;;  %s734_s24 = scalar_lea.vmem [#allocation7], %s2409_s2 }
  0x4b   : > { %s656_s11 = sshll.u32 %s655_s6, 4  ;;  %s742_s30 = sshll.u32 %s734_s24, 4  ;;  %s657_s11 = int_to_ptr.hbm [resolvable:$true] %s656_s11  ;;  %s743_s30 = int_to_ptr.vmem [resolvable:$true] %s742_s30 }
  0x4c   : > { %2855 = dma.hbm_to_vmem [thread:$0]  (!%p3466_p4), %s657_s11, 3072, %s659_s13, %s647_s27, %s3240_s5, %s3240_s5, %s3241_s10  }
  0x4d   : > { %772 = sbr.rel (%p3482_p6) target bundleno = 2835 (0xb13), region = 100  ;;  %s3505_s6 = sand.u32 (!%p3482_p6), 1, %s3212_s3  }
  0x4e   : > { %s2842_s10 = smul.u32 (!%p3482_p6), 192, %s3505_s6  ;;  %s775_s11 = scalar_lea.sflag (!%p3482_p6), [#allocation3], %s3505_s6 }
  0x4f   : > { %s739_s21 = scalar_lea.hbm %s4004_s12, %s2757_s9 }
  0x50   : > { %s740_s26 = sshll.u32 %s739_s21, 4  ;;  %s3509_s7 = scalar_lea.vmem (!%p3482_p6), [#allocation2], %s2842_s10  ;;  %s741_s26 = int_to_ptr.hbm [resolvable:$true] %s740_s26 }
  0x51   : > { %2861 = dma.hbm_to_vmem [thread:$0]  (!%p3466_p4), %s741_s26, 2048, %s743_s30, %s3476_s17, %s3238_s18, %s3238_s18, %s3239_s14  }
  0x52   : > { %3183 = dma.done.wait (%p3436_p8), %s775_s11, 3072  }
  0x53   : > { %3185 = vsyncadd (%p3436_p8), %s775_s11, 4294964224  ;;  %s784_s8 = sand.u32 1, %s3411_s22   ;;  %s2413_s9 = sshll.u32 %s3505_s6, 6 }
  0x54   : > { %s785_s13 = scalar_lea.sflag [#allocation6], %s784_s8  ;;  %s3517_s14 = scalar_lea.vmem [#allocation5], %s2413_s9 }
  0x55   : > { %3187 = dma.done.wait (%p3436_p8), %s785_s13, 3072  }
  0x56   : > { %3189 = vsyncadd (%p3436_p8), %s785_s13, 4294964224  ;;  %s2414_s18 = sshll.u32 %s3505_s6, 7  ;;  %s3954_s21 = sand.u32 1, %s3200_s25  }
  0x57   : > { %s2415_s5 = sshll.u32 %s3954_s21, 4  ;;  %s2416_s22 = sshll.u32 %s3224_s0, 1 }
  0x58   : > { %p913_p7 = scmp.lt.s32.totalorder %s2416_s22, 3  ;;  %p918_p9 = scmp.lt.s32.totalorder %s3224_s0, 1 }
  0x59   : > { %p921_p10 = scmp.lt.s32.totalorder %s3220_s29, 1  ;;  %s4005_s28 = sld [smem:[#allocation27_spill]] }
  0x5a   : > { %s4060_s22 = smov (!%p913_p7, %s2416_s22), 3  ;;  %s4007_s6 = sld [smem:[#allocation48_spill]] }
  0x5b   : > { %s3531_s20 = scalar_select %p918_p9, %s3224_s0, 1 }
  0x5c   : > { %s2417_s1 = sshll.u32 %s4060_s22, 3  ;;  %s4011_s12 = sld [smem:[#allocation32_spill]] }
  0x5d   : > { %s3541_s24 = scalar_select %p921_p10, %s3220_s29, 1 }
  0x5e   : > { %s4012_s25 = sld [smem:[#allocation37_spill]]  ;;  %p2423_p8 = scmp.ne.s32.totalorder %s3220_s29, 0 }
  0x5f   : > { %s916_s19 = scalar_lea.vmem %s4005_s28, %s2417_s1  ;;  %s2843_s11 = smul.u32 3, %s3541_s24 }
  0x60   : > { %s3546_s10 = scalar_lea.vmem %s4007_s6, %s2417_s1  ;;  %s2758_s1 = sshll.u32 %s3541_s24, 7 }
  0x61   : > { %s2420_s8 = sshll.u32 %s3541_s24, 1  ;;  %s4013_s15 = sld [smem:[#allocation38_spill]] }
  0x62   : > { %s3564_s4 = scalar_lea.vmem %s4011_s12, %s2843_s11  ;;  %s4014_s2 = sld [smem:[#allocation40_spill]] }
  0x63   : > { %s4015_s12 = sld [smem:[#allocation41_spill]] }
  0x64   : > { %s3570_s0 = scalar_lea.vmem %s4012_s25, %s2758_s1  ;;  %s4016_s22 = sld [smem:[#allocation42_spill]] }
  0x65   : > { %s3590_s25 = scalar_lea.vmem [#allocation7], %s2414_s18  ;;  %s3592_s1 = scalar_lea.vmem [#allocation8], %s2415_s5 }
  0x66   : > { %963 = sbr.rel (%p2423_p8) target bundleno = 383 (0x17f), region = 116  ;;  %s4018_s26 = sld [smem:[#allocation29_spill]] (!%p2423_p8) }
  0x67   : > { %s3576_s17 = scalar_lea.vmem %s4013_s15, %s2420_s8 }
  0x68   : > { %s945_s30 = scalar_lea.vmem %s4014_s2, %s3541_s24 }
  0x69   : > { %s948_s27 = scalar_lea.vmem %s4015_s12, %s3541_s24 }
  0x6a   : > { %s951_s3 = scalar_lea.vmem %s4016_s22, %s3541_s24 }
  0x6b   : > { %v964_v0 = vld [vmem:[%s916_s19] sm:$0xff]  ;;  %v965_v1 = vld [vmem:[%s916_s19 + $0x8] sm:$0xff]  ;;  %v3242_v2 = vmov 128.0   ;;  %s4017_s19 = sld [smem:[#allocation28_spill]] }
  0x6c   : > { %968 = vadd.xlane.f32.xlu0 %v964_v0  ;;  %2967 = vrcp.f32 %v3242_v2  ;;  %v2966_v34 = vld [vmem:[%s4018_s26] ss:$0 sm:$0xff] }
  0x71   : > { %v2965_v31 = vld [vmem:[%s4017_s19] ss:$0 sm:$0xff] }
  0x72   : > { %v2968_v3 = vpop.eup %2967 }
  0x73   : > { %v973_v4 = vmul.f32 128.0, %v2968_v3  ;;  %vm977_vm0 = vweird.f32 %v2968_v3 }
  0x74   : > { %970 = vadd.xlane.f32.xlu0 %v965_v1 }
  0x75   : > { %v974_v5 = vsub.f32 1.0, %v973_v4 }
  0x77   : > { %v975_v6 = vmul.f32 %v2968_v3, %v974_v5 }
  0x79   : > { %v976_v7 = vadd.f32 %v2968_v3, %v975_v6 }
  0x7b   : > { %v978_v8 = vsel %vm977_vm0, %v2968_v3, %v976_v7 }
  0xdf   : > { %v969_v9 = vpop.xlane.xlu0 %968 }
  0xe0   : > { %v979_v10 = vmul.f32 %v978_v8, %v969_v9 }
  0xe2   : > { %v981_v11 = vsub.f32 %v964_v0, %v979_v10 }
  0xe4   : > { %v983_v12 = vmul.f32 %v981_v11, %v981_v11 }
  0xe6   : > { %985 = vadd.xlane.f32.xlu1 %v983_v12 }
  0xe7   : > { %v971_v13 = vpop.xlane.xlu0 %970 }
  0xe8   : > { %v980_v14 = vmul.f32 %v978_v8, %v971_v13 }
  0xea   : > { %v982_v15 = vsub.f32 %v965_v1, %v980_v14 }
  0xec   : > { %v984_v16 = vmul.f32 %v982_v15, %v982_v15 }
  0xee   : > { %987 = vadd.xlane.f32.xlu1 %v984_v16 }
 0x159   : > { %v986_v17 = vpop.xlane.xlu1 %985 }
 0x15a   : > { %v989_v18 = vmul.f32 %v986_v17, %v978_v8 }
 0x15c   : > { %v991_v19 = vadd.f32 1e-12, %v989_v18 }
 0x15e   : > { %2969 = vrsqrt.f32 %v991_v19  ;;  %vm999_vm2 = vweird.f32 %v991_v19 }
 0x161   : > { %v988_v20 = vpop.xlane.xlu1 %987 }
 0x162   : > { %v990_v21 = vmul.f32 %v988_v20, %v978_v8 }
 0x164   : > { %v2970_v22 = vpop.eup %2969  ;;  %v992_v23 = vadd.f32 1e-12, %v990_v21 }
 0x165   : > { %v994_v24 = vmul.f32 %v2970_v22, %v991_v19  ;;  %vm1000_vm1 = vweird.f32 %v2970_v22 }
 0x166   : > { %2971 = vrsqrt.f32 %v992_v23  ;;  %vm1001_vm3 = vmor %vm999_vm2, %vm1000_vm1  ;;  %vm1009_vm5 = vweird.f32 %v992_v23 }
 0x167   : > { %v995_v25 = vmul.f32 %v2970_v22, %v994_v24 }
 0x169   : > { %v996_v26 = vmul.f32 0.5, %v995_v25 }
 0x16b   : > { %v997_v27 = vsub.f32 1.5, %v996_v26 }
 0x16c   : > { %v2972_v28 = vpop.eup %2971 }
 0x16d   : > { %v998_v29 = vmul.f32 %v2970_v22, %v997_v27  ;;  %v1004_v30 = vmul.f32 %v2972_v28, %v992_v23  ;;  %vm1010_vm4 = vweird.f32 %v2972_v28 }
 0x16e   : > { %vm1011_vm6 = vmor %vm1009_vm5, %vm1010_vm4 }
 0x16f   : > { %v1002_v32 = vsel %vm1001_vm3, %v2970_v22, %v998_v29  ;;  %v1005_v33 = vmul.f32 %v2972_v28, %v1004_v30 }
 0x170   : > { %v1013_v35 = vmul.f32 %v1002_v32, %v981_v11 }
 0x171   : > { %v1006_v36 = vmul.f32 0.5, %v1005_v33 }
 0x172   : > { %v1018_v37 = vmul.f32 %v2965_v31, %v1013_v35 }
 0x173   : > { %v1007_v38 = vsub.f32 1.5, %v1006_v36 }
 0x174   : > { %v1023_v39 = vadd.f32 %v2966_v34, %v1018_v37 }
 0x175   : > { %v1008_v40 = vmul.f32 %v2972_v28, %v1007_v38 }
 0x176   : > { %1025 = vst [vmem:[%s3592_s1] sm:$0xff] %v1023_v39 }
 0x177   : > { %v1012_v41 = vsel %vm1011_vm6, %v2972_v28, %v1008_v40 }
 0x178   : > { %v1014_v42 = vmul.f32 %v1012_v41, %v982_v15 }
 0x17a   : > { %v1019_v43 = vmul.f32 %v2965_v31, %v1014_v42 }
 0x17c   : > { %v1024_v44 = vadd.f32 %v2966_v34, %v1019_v43 }
 0x17e   : > { %1026 = vst [vmem:[%s3592_s1 + $0x8] sm:$0xff] %v1024_v44 }
 0x17f PF: > { %v2510_v45 = vld [vmem:[%s3509_s7 + $0xa8] sm:$0xf]  ;;  %v2781_v46 = vld [vmem:[%s3509_s7 + $0xb0] sm:$0xf0]  ;;  %v2780_v47 = vld [vmem:[%s3509_s7 + $0xac] sm:$0xf] }
 0x180   : > { %v2511_v48 = vor.u32 %v2781_v46, %v2510_v45  ;;  %v2512_v49 = vld [vmem:[%s3509_s7 + $0xb4] sm:$0xf0]  ;;  %v2498_v50 = vld [vmem:[%s3509_s7 + $0x90] sm:$0xf]  ;;  %v2778_v51 = vld [vmem:[%s3509_s7 + $0x98] sm:$0xf0] }
 0x181   : > { %v2515_v52 = vor.u32 %v2780_v47, %v2512_v49  ;;  %v2777_v53 = vld [vmem:[%s3509_s7 + $0x94] sm:$0xf]  ;;  %v2500_v54 = vld [vmem:[%s3509_s7 + $0x9c] sm:$0xf0]  ;;  %v2499_v55 = vor.u32 %v2778_v51, %v2498_v50  ;;  %v2486_v57 = vld [vmem:[%s3509_s7 + $0x78] sm:$0xf] }
 0x182   : > { %1198 = vmatpush.bf16.msra.mxu0 %v2511_v48  ;;  %v2503_v56 = vor.u32 %v2777_v53, %v2500_v54  ;;  %v2775_v58 = vld [vmem:[%s3509_s7 + $0x80] sm:$0xf0]  ;;  %v2774_v59 = vld [vmem:[%s3509_s7 + $0x7c] sm:$0xf]  ;;  %v2488_v60 = vld [vmem:[%s3509_s7 + $0x84] sm:$0xf0] }
 0x183   : > { %1212 = vmatpush.bf16.msra.mxu1 %v2515_v52  ;;  %v2487_v61 = vor.u32 %v2775_v58, %v2486_v57  ;;  %v2491_v62 = vor.u32 %v2774_v59, %v2488_v60  ;;  %v2474_v63 = vld [vmem:[%s3509_s7 + $0x60] sm:$0xf]  ;;  %v2772_v0 = vld [vmem:[%s3509_s7 + $0x68] sm:$0xf0]  ;;  %v2771_v1 = vld [vmem:[%s3509_s7 + $0x64] sm:$0xf] }
 0x184   : > { %v2476_v2 = vld [vmem:[%s3509_s7 + $0x6c] sm:$0xf0]  ;;  %v2475_v3 = vor.u32 %v2772_v0, %v2474_v63  ;;  %v2462_v4 = vld [vmem:[%s3509_s7 + $0x48] sm:$0xf]  ;;  %v2782_v6 = vld [vmem:[%s3509_s7 + $0xb8] sm:$0xf0] }
 0x185   : > { %v2518_v5 = vld [vmem:[%s3509_s7 + $0xb0] sm:$0xf]  ;;  %v2479_v7 = vor.u32 %v2771_v1, %v2476_v2  ;;  %v2769_v8 = vld [vmem:[%s3509_s7 + $0x50] sm:$0xf0]  ;;  %v2506_v10 = vld [vmem:[%s3509_s7 + $0x98] sm:$0xf] }
 0x186   : > { %1199 = vmatpush.bf16.msra.mxu0 %v2499_v55  ;;  %v2519_v9 = vor.u32 %v2782_v6, %v2518_v5  ;;  %v2779_v11 = vld [vmem:[%s3509_s7 + $0xa0] sm:$0xf0]  ;;  %v2768_v12 = vld [vmem:[%s3509_s7 + $0x4c] sm:$0xf]  ;;  %v2464_v13 = vld [vmem:[%s3509_s7 + $0x54] sm:$0xf0]  ;;  %v2463_v15 = vor.u32 %v2769_v8, %v2462_v4 }
 0x187   : > { %1213 = vmatpush.bf16.msra.mxu1 %v2503_v56  ;;  %v2507_v14 = vor.u32 %v2779_v11, %v2506_v10  ;;  %v2450_v16 = vld [vmem:[%s3509_s7 + $0x30] sm:$0xf]  ;;  %v2494_v17 = vld [vmem:[%s3509_s7 + $0x80] sm:$0xf]  ;;  %v2776_v18 = vld [vmem:[%s3509_s7 + $0x88] sm:$0xf0]  ;;  %v2467_v19 = vor.u32 %v2768_v12, %v2464_v13 }
 0x188   : > { %1226 = vmatpush.bf16.msra.mxu2 %v2519_v9  ;;  %v2766_v20 = vld [vmem:[%s3509_s7 + $0x38] sm:$0xf0]  ;;  %v2765_v21 = vld [vmem:[%s3509_s7 + $0x34] sm:$0xf]  ;;  %v2452_v22 = vld [vmem:[%s3509_s7 + $0x3c] sm:$0xf0]  ;;  %v2495_v24 = vor.u32 %v2776_v18, %v2494_v17 }
 0x189   : > { %v2482_v23 = vld [vmem:[%s3509_s7 + $0x68] sm:$0xf]  ;;  %v2451_v25 = vor.u32 %v2766_v20, %v2450_v16  ;;  %v2773_v26 = vld [vmem:[%s3509_s7 + $0x70] sm:$0xf0]  ;;  %v2455_v27 = vor.u32 %v2765_v21, %v2452_v22  ;;  %v2438_v28 = vld [vmem:[%s3509_s7 + $0x18] sm:$0xf] }
 0x18a   : > { %1200 = vmatpush.bf16.msra.mxu0 %v2487_v61  ;;  %v2763_v29 = vld [vmem:[%s3509_s7 + $0x20] sm:$0xf0]  ;;  %v2762_v30 = vld [vmem:[%s3509_s7 + $0x1c] sm:$0xf]  ;;  %v2440_v31 = vld [vmem:[%s3509_s7 + $0x24] sm:$0xf0]  ;;  %v2483_v32 = vor.u32 %v2773_v26, %v2482_v23 }
 0x18b   : > { %1214 = vmatpush.bf16.msra.mxu1 %v2491_v62  ;;  %v2439_v33 = vor.u32 %v2763_v29, %v2438_v28  ;;  %v2470_v34 = vld [vmem:[%s3509_s7 + $0x50] sm:$0xf]  ;;  %v2770_v35 = vld [vmem:[%s3509_s7 + $0x58] sm:$0xf0]  ;;  %v2443_v36 = vor.u32 %v2762_v30, %v2440_v31  ;;  %v2426_v37 = vld [vmem:[%s3509_s7] sm:$0xf] }
 0x18c   : > { %1227 = vmatpush.bf16.msra.mxu2 %v2507_v14  ;;  %v2760_v38 = vld [vmem:[%s3509_s7 + $0x8] sm:$0xf0]  ;;  %v2759_v39 = vld [vmem:[%s3509_s7 + $0x4] sm:$0xf]  ;;  %v2428_v40 = vld [vmem:[%s3509_s7 + $0xc] sm:$0xf0]  ;;  %v2471_v42 = vor.u32 %v2770_v35, %v2470_v34 }
 0x18d   : > { %v3646_v41 = vld [vmem:[%s3592_s1] sm:$0xff]  ;;  %v2427_v43 = vor.u32 %v2760_v38, %v2426_v37  ;;  %v3649_v44 = vld [vmem:[%s3592_s1 + $0x8] sm:$0xff]  ;;  %v2431_v47 = vor.u32 %v2759_v39, %v2428_v40  ;;  %vm1259_vm7 = vcmask 523264   ;;  %s3243_s6 = smov 64   ;;  %s4019_s8 = sld [smem:[#allocation30_spill]]  ;;  %vm1287_vm8 = vcmask 130048  }
 0x18e   : > { %1201 = vmatpush.bf16.msra.mxu0 %v2475_v3  ;;  %v2458_v45 = vld [vmem:[%s3509_s7 + $0x38] sm:$0xf]  ;;  %v2767_v46 = vld [vmem:[%s3509_s7 + $0x40] sm:$0xf0]  ;;  %v1029_v48 = vpack.c.bf16 %v3649_v44, %v3646_v41  ;;  %v2446_v50 = vld [vmem:[%s3509_s7 + $0x20] sm:$0xf] }
 0x18f   : > { %1215 = vmatpush.bf16.msra.mxu1 %v2479_v7  ;;  %v2459_v49 = vor.u32 %v2767_v46, %v2458_v45  ;;  %v2764_v51 = vld [vmem:[%s3509_s7 + $0x28] sm:$0xf0]  ;;  %v2434_v53 = vld [vmem:[%s3509_s7 + $0x8] sm:$0xf]  ;;  %v2761_v54 = vld [vmem:[%s3509_s7 + $0x10] sm:$0xf0] }
 0x190   : > { %1228 = vmatpush.bf16.msra.mxu2 %v2495_v24  ;;  %v2447_v52 = vor.u32 %v2764_v51, %v2446_v50  ;;  %v2435_v55 = vor.u32 %v2761_v54, %v2434_v53  ;;  %v1062_v57 = vld [vmem:[%s3564_s4] sm:$0x7]  ;;  %v2786_v34 = vld [vmem:[%s3517_s14 + $0x18] sm:$0xff]  ;;  %v2784_v45 = vld [vmem:[%s3517_s14 + $0x8] sm:$0xff]  ;;  %s4021_s15 = sld [smem:[#allocation34_spill]]  ;;  %p2686_p11 = scmp.ne.s32.totalorder %s3220_s29, 1 }
 0x191   : > { %v1065_v59 = vperm.slane %v1062_v57, 1  ;;  %v1064_v63 = vperm.slane %v1062_v57, 0  ;;  %v1066_v7 = vperm.slane %v1062_v57, 2  ;;  %v2783_v46 = vld [vmem:[%s3517_s14] sm:$0xff]  ;;  %s4023_s16 = sld [smem:[#allocation35_spill]] }
 0x192   : > { %1202 = vmatpush.bf16.msra.mxu0 %v2463_v15  ;;  %s4025_s11 = sld [smem:[#allocation36_spill]] }
 0x193   : > { %1216 = vmatpush.bf16.msra.mxu1 %v2467_v19  ;;  %s4020_s9 = scalar_lea.vmem %s4019_s8, %s3531_s20  ;;  %s4032_s13 = sld [smem:[#allocation45_spill]] (!%p2686_p11) }
 0x194   : > { %1229 = vmatpush.bf16.msra.mxu2 %v2483_v32  ;;  %v2973_v14 = vld [vmem:[%s4020_s9] ss:$0 sm:$0xff] }
 0x196   : > { %1203 = vmatpush.bf16.msra.mxu0 %v2451_v25  ;;  %s4022_s28 = scalar_lea.vmem %s4021_s15, %s3541_s24 }
 0x197   : > { %1217 = vmatpush.bf16.msra.mxu1 %v2455_v27  ;;  %s4024_s2 = scalar_lea.vmem %s4023_s16, %s3541_s24 }
 0x198   : > { %1230 = vmatpush.bf16.msra.mxu2 %v2471_v42  ;;  %s4026_s18 = scalar_lea.vmem %s4025_s11, %s3541_s24 }
 0x19a   : > { %1204 = vmatpush.bf16.msra.mxu0 %v2439_v33 }
 0x19b   : > { %1218 = vmatpush.bf16.msra.mxu1 %v2443_v36 }
 0x19c   : > { %1231 = vmatpush.bf16.msra.mxu2 %v2459_v49 }
 0x19e   : > { %1205 = vmatpush.bf16.msra.mxu0 %v2427_v43  ;;  %v2785_v43 = vld [vmem:[%s3517_s14 + $0x10] sm:$0xff] }
 0x19f   : > { %1219 = vmatpush.bf16.msra.mxu1 %v2431_v47 }
 0x1a0   : > { %1232 = vmatpush.bf16.msra.mxu2 %v2447_v52 }
 0x1a1   : > { %1206 = vmatmul.bf16.vlgmr.msra.gmra.mxu0 %v1029_v48 }
 0x1a2   : > { %1220 = vmatmul.bf16.vlgmr.msra.gmra.mxu1 %v1029_v48 }
 0x1a4   : > { %1233 = vmatpush.bf16.msra.mxu2 %v2435_v55 }
 0x1a7   : > { %1234 = vmatmul.bf16.vlgmr.msra.gmra.mxu2 %v1029_v48 }
 0x1a8   : > { %1477 = vmatpush.bf16.msrb.mxu2 %v2786_v34 }
 0x1ac   : > { %1478 = vmatpush.bf16.msrb.mxu2 %v2785_v43 }
 0x1b0   : > { %1479 = vmatpush.bf16.msrb.mxu2 %v2784_v45  ;;  %v2616_v45 = vld [vmem:[%s3570_s0 + $0x70] sm:$0xf] }
 0x1b4   : > { %1480 = vmatpush.bf16.msrb.mxu2 %v2783_v46  ;;  %v2806_v46 = vld [vmem:[%s3570_s0 + $0x74] sm:$0xf0] }
 0x21e   : > { %v1207_v58 = vpop.f32.mrf.mxu0 }
 0x21f   : > { %v1221_v56 = vpop.f32.mrf.mxu1  ;;  %v1208_v3 = vadd.f32 %v1207_v58, %v1064_v63 }
 0x220   : > { %v1222_v61 = vadd.f32 %v1221_v56, %v1065_v59 }
 0x226   : > { %v1209_v1 = vpop.f32.mrf.mxu0 }
 0x227   : > { %v1223_v60 = vpop.f32.mrf.mxu1  ;;  %v1210_v4 = vadd.f32 %v1209_v1, %v1064_v63 }
 0x228   : > { %v1224_v62 = vadd.f32 %v1223_v60, %v1065_v59 }
 0x229   : > { %v1257_v5 = vpack.c.bf16 %v1210_v4, %v1208_v3 }
 0x22a   : > { %v1258_v0 = vpack.c.bf16 %v1224_v62, %v1222_v61  ;;  %v1235_v6 = vpop.f32.mrf.mxu2 }
 0x22b   : > { %v1236_v9 = vadd.f32 %v1235_v6, %v1066_v7  ;;  %v2789_v6 = vld [vmem:[%s3517_s14 + $0x30] sm:$0xff] }
 0x22c   : > { %1334 = vrot.lane.b32.xlu2 %v1258_v0, %s3243_s6  ;;  %v1264_v2 = vsel %vm1259_vm7, %v1258_v0, 0 }
 0x22d   : > { %1273 = vmatpush.bf16.xpose.msra.mxu3 %v1264_v2 }
 0x232   : > { %v1237_v8 = vpop.f32.mrf.mxu2 }
 0x233   : > { %v1238_v10 = vadd.f32 %v1237_v8, %v1066_v7 }
 0x234   : > { %1331 = vrot.lane.b32.xlu2 %v1257_v5, %s3243_s6  ;;  %2520 = vmatmul.msk.bf16.vlgmr.msra.gmra.mxu3 %vm1259_vm7, %v1257_v5  ;;  %v2790_v5 = vld [vmem:[%s3517_s14 + $0x38] sm:$0xff] }
 0x235   : > { %v3664_v11 = vpack.c.bf16 %v1238_v10, %v1236_v9  ;;  %1436 = vmatpush.bf16.msrb.mxu1 %v2790_v5  ;;  %v2584_v5 = vld [vmem:[%s3570_s0 + $0x30] sm:$0xf] }
 0x237   : > { %1322 = vmatpush.bf16.msrb.mxu3 %v3664_v11 }
 0x239   : > { %1437 = vmatpush.bf16.msrb.mxu1 %v2789_v6  ;;  %v2798_v6 = vld [vmem:[%s3570_s0 + $0x34] sm:$0xf0] }
 0x286   : > { %v1335_v12 = vpop.permute.xlu2 %1334 }
 0x287   : > { %v1340_v13 = vsel %vm1259_vm7, %v1335_v12, 0 }
 0x288   : > { %1349 = vmatpush.bf16.xpose.msra.mxu3 %v1340_v13 }
 0x28e   : > { %v1332_v42 = vpop.permute.xlu2 %1331 }
 0x2b7   : > { %v1275_v15 = vpop.f32.mrf.mxu3 }
 0x2b8   : > { %v1280_v16 = vmul.f32 0.125, %v1275_v15  ;;  %v2787_v15 = vld [vmem:[%s3517_s14 + $0x20] sm:$0xff] }
 0x2ba   : > { %v1285_v17 = vadd.f32 %v2973_v14, %v1280_v16 }
 0x2bc   : > { %v1288_v18 = vsel %vm1287_vm8, %v1285_v17, -inf }
 0x2bd   : > { %1289 = vmax.xlane.f32.xlu0 %v1288_v18 }
 0x2bf   : > { %v1277_v19 = vpop.f32.mrf.mxu3 }
 0x2c0   : > { %v1281_v20 = vmul.f32 0.125, %v1277_v19 }
 0x2c2   : > { %v1286_v21 = vadd.f32 %v2973_v14, %v1281_v20  ;;  %v2974_v20 = vld [vmem:[%s4022_s28] ss:$0 sm:$0xff]  ;;  %s4033_s28 = sld [smem:[#allocation44_spill]] (!%p2686_p11) }
 0x2c4   : > { %v1291_v22 = vsel %vm1287_vm8, %v1286_v21, -inf }
 0x2c5   : > { %1292 = vmax.xlane.f32.xlu0 %v1291_v22 }
 0x330   : > { %v1290_v23 = vpop.xlane.xlu0 %1289 }
 0x331   : > { %v1294_v24 = vsub.f32 %v1285_v17, %v1290_v23 }
 0x333   : > { %v1296_v25 = vmul.f32 1.442695, %v1294_v24 }
 0x335   : > { %2980 = vpow2.f32 %v1296_v25 }
 0x338   : > { %v1293_v26 = vpop.xlane.xlu0 %1292 }
 0x339   : > { %v1295_v27 = vsub.f32 %v1286_v21, %v1293_v26 }
 0x33b   : > { %v2981_v28 = vpop.eup %2980  ;;  %v1298_v29 = vmul.f32 1.442695, %v1295_v27 }
 0x33c   : > { %v1300_v30 = vsel %vm1287_vm8, %v2981_v28, 0.0 }
 0x33d   : > { %2982 = vpow2.f32 %v1298_v29  ;;  %1301 = vadd.xlane.f32.xlu1 %v1300_v30  ;;  %v3244_v30 = vmov 128.0  }
 0x343   : > { %v2983_v31 = vpop.eup %2982 }
 0x344   : > { %v1303_v32 = vsel %vm1287_vm8, %v2983_v31, 0.0 }
 0x345   : > { %1304 = vadd.xlane.f32.xlu1 %v1303_v32 }
 0x3b0   : > { %v1302_v33 = vpop.xlane.xlu1 %1301 }
 0x3b1   : > { %2984 = vrcp.f32 %v1302_v33 }
 0x3b7   : > { %v2985_v36 = vpop.eup %2984 }
 0x3b8   : > { %v1305_v35 = vpop.xlane.xlu1 %1304  ;;  %v1308_v38 = vmul.f32 %v2985_v36, %v2981_v28 }
 0x3b9   : > { %2986 = vrcp.f32 %v1305_v35 }
 0x3bf   : > { %v2987_v37 = vpop.eup %2986 }
 0x3c0   : > { %v1309_v39 = vmul.f32 %v2987_v37, %v2983_v31 }
 0x3c2   : > { %v1310_v40 = vpack.c.bf16 %v1309_v39, %v1308_v38 }
 0x3c4   : > { %2521 = vmatmul.msk.bf16.vlgmr.msrb.gmra.mxu3 %vm1287_vm8, %v1310_v40 }
 0x3d4   : > { %2522 = vmatmul.msk.bf16.vlgmr.msra.gmra.mxu3 %vm1259_vm7, %v1332_v42 }
 0x447   : > { %v1324_v47 = vpop.f32.mrf.mxu3 }
 0x44f   : > { %v1326_v48 = vpop.f32.mrf.mxu3 }
 0x450   : > { %v1329_v49 = vpack.c.bf16 %v1326_v48, %v1324_v47  ;;  %v2805_v47 = vld [vmem:[%s3570_s0 + $0x74] sm:$0xf]  ;;  %v2617_v48 = vor.u32 %v2806_v46, %v2616_v45 }
 0x452   : > { %2557 = vmatmul.msk.bf16.vlgmr.msrb.gmra.mxu2 %vm1259_vm7, %v1329_v49  ;;  %v2618_v49 = vld [vmem:[%s3570_s0 + $0x78] sm:$0xf0]  ;;  %1657 = vmatpush.bf16.msrb.mxu3 %v2617_v48 }
 0x457   : > { %v1351_v50 = vpop.f32.mrf.mxu3 }
 0x458   : > { %v1356_v51 = vmul.f32 0.125, %v1351_v50  ;;  %v2621_v50 = vor.u32 %v2805_v47, %v2618_v49 }
 0x45a   : > { %v1358_v52 = vadd.f32 %v2973_v14, %v1356_v51  ;;  %v2608_v51 = vld [vmem:[%s3570_s0 + $0x60] sm:$0xf] }
 0x45c   : > { %v1360_v53 = vsel %vm1287_vm8, %v1358_v52, -inf }
 0x45d   : > { %1361 = vmax.xlane.f32.xlu0 %v1360_v53  ;;  %v2803_v53 = vld [vmem:[%s3570_s0 + $0x64] sm:$0xf] }
 0x45f   : > { %v1353_v54 = vpop.f32.mrf.mxu3 }
 0x460   : > { %v1357_v55 = vmul.f32 0.125, %v1353_v54 }
 0x462   : > { %v1359_v56 = vadd.f32 %v2973_v14, %v1357_v55  ;;  %v2788_v14 = vld [vmem:[%s3517_s14 + $0x28] sm:$0xff]  ;;  %s4034_s14 = sld [smem:[#allocation46_spill]] (!%p2686_p11) }
 0x463   : > { %1438 = vmatpush.bf16.msrb.mxu1 %v2788_v14  ;;  %v2610_v55 = vld [vmem:[%s3570_s0 + $0x68] sm:$0xf0] }
 0x464   : > { %v1363_v57 = vsel %vm1287_vm8, %v1359_v56, -inf }
 0x465   : > { %1364 = vmax.xlane.f32.xlu1 %v1363_v57  ;;  %v2600_v57 = vld [vmem:[%s3570_s0 + $0x50] sm:$0xf] }
 0x467   : > { %1439 = vmatpush.bf16.msrb.mxu1 %v2787_v15  ;;  %v2578_v15 = vld [vmem:[%s3570_s0 + $0x28] sm:$0xf0] }
 0x47e   : > { %1384 = vrot.lane.b32.xlu1 %v3664_v11, %s3243_s6 }
 0x4d0   : > { %v1362_v58 = vpop.xlane.xlu0 %1361 }
 0x4d1   : > { %v1366_v59 = vsub.f32 %v1358_v52, %v1362_v58  ;;  %v2804_v52 = vld [vmem:[%s3570_s0 + $0x64] sm:$0xf0]  ;;  %v2802_v58 = vld [vmem:[%s3570_s0 + $0x54] sm:$0xf0] }
 0x4d2   : > { %v2609_v54 = vor.u32 %v2804_v52, %v2608_v51  ;;  %v2975_v51 = vld [vmem:[%s4024_s2] ss:$0 sm:$0xff] }
 0x4d3   : > { %v1368_v60 = vmul.f32 1.442695, %v1366_v59  ;;  %v2801_v59 = vld [vmem:[%s3570_s0 + $0x54] sm:$0xf] }
 0x4d4   : > { %1658 = vmatpush.bf16.msrb.mxu3 %v2609_v54 }
 0x4d5   : > { %2988 = vpow2.f32 %v1368_v60  ;;  %v1482_v19 = vpop.f32.mrf.mxu2  ;;  %v2601_v60 = vor.u32 %v2802_v58, %v2600_v57 }
 0x4d8   : > { %v1365_v61 = vpop.xlane.xlu1 %1364  ;;  %1659 = vmatpush.bf16.msrb.mxu3 %v2601_v60  ;;  %v2821_v60 = vld [vmem:[%s3590_s25 + $0x70] sm:$0xff] }
 0x4d9   : > { %v1367_v62 = vsub.f32 %v1359_v56, %v1365_v61  ;;  %v2613_v56 = vor.u32 %v2803_v53, %v2610_v55  ;;  %v2602_v61 = vld [vmem:[%s3570_s0 + $0x58] sm:$0xf0] }
 0x4db   : > { %v2989_v63 = vpop.eup %2988  ;;  %v1370_v0 = vmul.f32 1.442695, %v1367_v62  ;;  %v2605_v62 = vor.u32 %v2801_v59, %v2602_v61  ;;  %v2814_v61 = vld [vmem:[%s3590_s25 + $0x38] sm:$0xff] }
 0x4dc   : > { %v1372_v1 = vsel %vm1287_vm8, %v2989_v63, 0.0  ;;  %1855 = vmatpush.bf16.msra.mxu1 %v2814_v61 }
 0x4dd   : > { %2990 = vpow2.f32 %v1370_v0  ;;  %1373 = vadd.xlane.f32.xlu2 %v1372_v1  ;;  %v1484_v25 = vpop.f32.mrf.mxu2  ;;  %v2800_v0 = vld [vmem:[%s3570_s0 + $0x44] sm:$0xf0]  ;;  %v2799_v1 = vld [vmem:[%s3570_s0 + $0x44] sm:$0xf] }
 0x4e3   : > { %v2991_v2 = vpop.eup %2990 }
 0x4e4   : > { %v1375_v3 = vsel %vm1287_vm8, %v2991_v2, 0.0 }
 0x4e5   : > { %1376 = vadd.xlane.f32.xlu0 %v1375_v3  ;;  %v2594_v3 = vld [vmem:[%s3570_s0 + $0x48] sm:$0xf0] }
 0x4f0   : > { %v1385_v4 = vpop.permute.xlu1 %1384 }
 0x4f1   : > { %1397 = vmatpush.bf16.msrb.mxu0 %v1385_v4  ;;  %v2597_v4 = vor.u32 %v2799_v1, %v2594_v3  ;;  %v2812_v1 = vld [vmem:[%s3590_s25 + $0x28] sm:$0xff]  ;;  %v2811_v3 = vld [vmem:[%s3590_s25 + $0x20] sm:$0xff] }
 0x4f5   : > { %1671 = vmatpush.bf16.msra.mxu0 %v2621_v50 }
 0x4f9   : > { %1672 = vmatpush.bf16.msra.mxu0 %v2613_v56 }
 0x4fd   : > { %1673 = vmatpush.bf16.msra.mxu0 %v2605_v62  ;;  %v2820_v62 = vld [vmem:[%s3590_s25 + $0x68] sm:$0xff] }
 0x501   : > { %1674 = vmatpush.bf16.msra.mxu0 %v2597_v4  ;;  %v2817_v4 = vld [vmem:[%s3590_s25 + $0x50] sm:$0xff] }
 0x550   : > { %v1374_v7 = vpop.xlane.xlu2 %1373 }
 0x551   : > { %2992 = vrcp.f32 %v1374_v7  ;;  %v2797_v7 = vld [vmem:[%s3570_s0 + $0x34] sm:$0xf] }
 0x557   : > { %v2993_v9 = vpop.eup %2992 }
 0x558   : > { %v1377_v8 = vpop.xlane.xlu0 %1376  ;;  %v1380_v11 = vmul.f32 %v2993_v9, %v2989_v63  ;;  %v2592_v63 = vld [vmem:[%s3570_s0 + $0x40] sm:$0xf]  ;;  %v2586_v9 = vld [vmem:[%s3570_s0 + $0x38] sm:$0xf0] }
 0x559   : > { %2994 = vrcp.f32 %v1377_v8  ;;  %v2585_v8 = vor.u32 %v2798_v6, %v2584_v5  ;;  %v2810_v5 = vld [vmem:[%s3590_s25 + $0x18] sm:$0xff]  ;;  %v1571_v6 = vld [vmem:[%s3576_s17] sm:$0x3] }
 0x55a   : > { %2996 = vrcp.f32 %v3244_v30 }
 0x55f   : > { %v2995_v10 = vpop.eup %2994 }
 0x560   : > { %v1381_v12 = vmul.f32 %v2995_v10, %v2991_v2  ;;  %v2997_v31 = vpop.eup %2996  ;;  %v2593_v2 = vor.u32 %v2800_v0, %v2592_v63  ;;  %v2589_v10 = vor.u32 %v2797_v7, %v2586_v9  ;;  %v2813_v63 = vld [vmem:[%s3590_s25 + $0x30] sm:$0xff]  ;;  %v2819_v0 = vld [vmem:[%s3590_s25 + $0x60] sm:$0xff]  ;;  %v2816_v7 = vld [vmem:[%s3590_s25 + $0x48] sm:$0xff] }
 0x561   : > { %v1502_v32 = vmul.f32 128.0, %v2997_v31  ;;  %vm1506_vm9 = vweird.f32 %v2997_v31  ;;  %1856 = vmatpush.bf16.msra.mxu1 %v2813_v63  ;;  %v2809_v9 = vld [vmem:[%s3590_s25 + $0x10] sm:$0xff]  ;;  %v2977_v63 = vld [vmem:[%s945_s30] ss:$0 sm:$0xff] }
 0x562   : > { %v1382_v13 = vpack.c.bf16 %v1381_v12, %v1380_v11  ;;  %1660 = vmatpush.bf16.msrb.mxu3 %v2593_v2  ;;  %1675 = vmatpush.bf16.msra.mxu0 %v2589_v10  ;;  %v2576_v11 = vld [vmem:[%s3570_s0 + $0x20] sm:$0xf]  ;;  %v2796_v12 = vld [vmem:[%s3570_s0 + $0x24] sm:$0xf0]  ;;  %v2818_v2 = vld [vmem:[%s3590_s25 + $0x58] sm:$0xff] }
 0x563   : > { %v1503_v33 = vsub.f32 1.0, %v1502_v32  ;;  %v2577_v14 = vor.u32 %v2796_v12, %v2576_v11  ;;  %v2815_v10 = vld [vmem:[%s3590_s25 + $0x40] sm:$0xff] }
 0x564   : > { %2523 = vmatmul.msk.bf16.vlgmr.msrb.gmra.mxu0 %vm1287_vm8, %v1382_v13  ;;  %v2795_v13 = vld [vmem:[%s3570_s0 + $0x24] sm:$0xf] }
 0x565   : > { %v1504_v34 = vmul.f32 %v2997_v31, %v1503_v33  ;;  %1857 = vmatpush.bf16.msra.mxu1 %v2812_v1 }
 0x566   : > { %1661 = vmatpush.bf16.msrb.mxu3 %v2585_v8  ;;  %v1574_v8 = vperm.slane %v1571_v6, 1 }
 0x567   : > { %v1505_v35 = vadd.f32 %v2997_v31, %v1504_v34 }
 0x569   : > { %1858 = vmatpush.bf16.msra.mxu1 %v2811_v3 }
 0x56a   : > { %1662 = vmatpush.bf16.msrb.mxu3 %v2577_v14 }
 0x56d   : > { %1859 = vmatpush.bf16.msra.mxu1 %v2810_v5 }
 0x571   : > { %1860 = vmatpush.bf16.msra.mxu1 %v2809_v9 }
 0x5e1   : > { %v1399_v16 = vpop.f32.mrf.mxu0 }
 0x5e9   : > { %v1401_v17 = vpop.f32.mrf.mxu0 }
 0x5ea   : > { %v1404_v18 = vpack.c.bf16 %v1401_v17, %v1399_v16  ;;  %v2581_v16 = vor.u32 %v2795_v13, %v2578_v15  ;;  %v2568_v17 = vld [vmem:[%s3570_s0 + $0x10] sm:$0xf]  ;;  %v2808_v13 = vld [vmem:[%s3590_s25 + $0x8] sm:$0xff]  ;;  %v1573_v15 = vperm.slane %v1571_v6, 0 }
 0x5eb   : > { %1861 = vmatpush.bf16.msra.mxu1 %v2808_v13 }
 0x5ec   : > { %2540 = vmatmul.msk.bf16.vlgmr.msrb.gmra.mxu1 %vm1259_vm7, %v1404_v18  ;;  %1676 = vmatpush.bf16.msra.mxu0 %v2581_v16  ;;  %v2794_v18 = vld [vmem:[%s3570_s0 + $0x14] sm:$0xf0] }
 0x669   : > { %v1441_v21 = vpop.f32.mrf.mxu1 }
 0x66a   : > { %v1483_v22 = vadd.f32 %v1482_v19, %v1441_v21  ;;  %v2793_v19 = vld [vmem:[%s3570_s0 + $0x14] sm:$0xf]  ;;  %v2570_v21 = vld [vmem:[%s3570_s0 + $0x18] sm:$0xf0] }
 0x66c   : > { %v1491_v23 = vadd.f32 %v2974_v20, %v1483_v22  ;;  %v2573_v22 = vor.u32 %v2793_v19, %v2570_v21 }
 0x66e   : > { %v1493_v24 = vadd.f32 %v1491_v23, %v3646_v41  ;;  %v3703_v41 = vsel %vm1506_vm9, %v2997_v31, %v1505_v35  ;;  %v2560_v23 = vld [vmem:[%s3570_s0] sm:$0xf]  ;;  %1677 = vmatpush.bf16.msra.mxu0 %v2573_v22 }
 0x670   : > { %1497 = vadd.xlane.f32.xlu0 %v1493_v24 }
 0x671   : > { %v1443_v26 = vpop.f32.mrf.mxu1 }
 0x672   : > { %v1485_v27 = vadd.f32 %v1484_v25, %v1443_v26  ;;  %v2791_v25 = vld [vmem:[%s3570_s0 + $0x4] sm:$0xf] }
 0x674   : > { %v1492_v28 = vadd.f32 %v2974_v20, %v1485_v27  ;;  %v2569_v20 = vor.u32 %v2794_v18, %v2568_v17  ;;  %v2807_v17 = vld [vmem:[%s3590_s25] sm:$0xff] }
 0x675   : > { %1862 = vmatpush.bf16.msra.mxu1 %v2807_v17 }
 0x676   : > { %v1494_v29 = vadd.f32 %v1492_v28, %v3649_v44  ;;  %1663 = vmatpush.bf16.msrb.mxu3 %v2569_v20  ;;  %v2562_v28 = vld [vmem:[%s3570_s0 + $0x8] sm:$0xf0] }
 0x677   : > { %v2565_v30 = vor.u32 %v2791_v25, %v2562_v28 }
 0x678   : > { %1499 = vadd.xlane.f32.xlu0 %v1494_v29 }
 0x679   : > { %1678 = vmatpush.bf16.msra.mxu0 %v2565_v30 }
 0x6e3   : > { %v1498_v36 = vpop.xlane.xlu0 %1497 }
 0x6e4   : > { %v1508_v37 = vmul.f32 %v3703_v41, %v1498_v36 }
 0x6e6   : > { %v3706_v38 = vsub.f32 %v1493_v24, %v1508_v37  ;;  %v2792_v24 = vld [vmem:[%s3570_s0 + $0x4] sm:$0xf0] }
 0x6e7   : > { %v2561_v27 = vor.u32 %v2792_v24, %v2560_v23 }
 0x6e8   : > { %v1512_v44 = vmul.f32 %v3706_v38, %v3706_v38 }
 0x6e9   : > { %1664 = vmatpush.bf16.msrb.mxu3 %v2561_v27 }
 0x6ea   : > { %1514 = vadd.xlane.f32.xlu0 %v1512_v44 }
 0x6eb   : > { %v1500_v39 = vpop.xlane.xlu0 %1499 }
 0x6ec   : > { %v1509_v40 = vmul.f32 %v3703_v41, %v1500_v39 }
 0x6ee   : > { %v3711_v42 = vsub.f32 %v1494_v29, %v1509_v40 }
 0x6f0   : > { %v1513_v43 = vmul.f32 %v3711_v42, %v3711_v42 }
 0x6f2   : > { %1516 = vadd.xlane.f32.xlu1 %v1513_v43 }
 0x75d   : > { %v1515_v26 = vpop.xlane.xlu0 %1514 }
 0x75e   : > { %v1518_v29 = vmul.f32 %v1515_v26, %v3703_v41 }
 0x760   : > { %v1520_v31 = vadd.f32 1e-12, %v1518_v29 }
 0x762   : > { %2998 = vrsqrt.f32 %v1520_v31  ;;  %vm1528_vm11 = vweird.f32 %v1520_v31 }
 0x765   : > { %v1517_v32 = vpop.xlane.xlu1 %1516 }
 0x766   : > { %v1519_v33 = vmul.f32 %v1517_v32, %v3703_v41 }
 0x768   : > { %v2999_v34 = vpop.eup %2998  ;;  %v1521_v35 = vadd.f32 1e-12, %v1519_v33 }
 0x769   : > { %v1523_v36 = vmul.f32 %v2999_v34, %v1520_v31  ;;  %vm1529_vm10 = vweird.f32 %v2999_v34 }
 0x76a   : > { %3000 = vrsqrt.f32 %v1521_v35  ;;  %vm1530_vm12 = vmor %vm1528_vm11, %vm1529_vm10  ;;  %vm1538_vm14 = vweird.f32 %v1521_v35 }
 0x76b   : > { %v1524_v37 = vmul.f32 %v2999_v34, %v1523_v36 }
 0x76d   : > { %v1525_v44 = vmul.f32 0.5, %v1524_v37 }
 0x76f   : > { %v1526_v39 = vsub.f32 1.5, %v1525_v44 }
 0x770   : > { %v3001_v40 = vpop.eup %3000 }
 0x771   : > { %v1527_v43 = vmul.f32 %v2999_v34, %v1526_v39  ;;  %v1533_v45 = vmul.f32 %v3001_v40, %v1521_v35  ;;  %vm1539_vm13 = vweird.f32 %v3001_v40 }
 0x772   : > { %vm1540_vm15 = vmor %vm1538_vm14, %vm1539_vm13 }
 0x773   : > { %v1534_v46 = vmul.f32 %v3001_v40, %v1533_v45  ;;  %v1531_v47 = vsel %vm1530_vm12, %v2999_v34, %v1527_v43 }
 0x774   : > { %v1542_v50 = vmul.f32 %v1531_v47, %v3706_v38  ;;  %v2976_v38 = vld [vmem:[%s4026_s18] ss:$0 sm:$0xff] }
 0x775   : > { %v1535_v48 = vmul.f32 0.5, %v1534_v46 }
 0x776   : > { %v1547_v55 = vmul.f32 %v2975_v51, %v1542_v50 }
 0x777   : > { %v1536_v49 = vsub.f32 1.5, %v1535_v48 }
 0x778   : > { %v3761_v57 = vadd.f32 %v2976_v38, %v1547_v55 }
 0x779   : > { %v1537_v52 = vmul.f32 %v3001_v40, %v1536_v49 }
 0x77b   : > { %v1541_v53 = vsel %vm1540_vm15, %v3001_v40, %v1537_v52 }
 0x77c   : > { %v1543_v54 = vmul.f32 %v1541_v53, %v3711_v42  ;;  %v2822_v42 = vld [vmem:[%s3590_s25 + $0x78] sm:$0xff] }
 0x77d   : > { %1869 = vmatpush.bf16.msra.mxu2 %v2822_v42 }
 0x77e   : > { %v1548_v56 = vmul.f32 %v2975_v51, %v1543_v54 }
 0x780   : > { %v3763_v58 = vadd.f32 %v2976_v38, %v1548_v56 }
 0x781   : > { %1870 = vmatpush.bf16.msra.mxu2 %v2821_v60 }
 0x782   : > { %v1554_v59 = vpack.c.bf16 %v3763_v58, %v3761_v57 }
 0x784   : > { %1665 = vmatmul.bf16.vlgmr.msrb.gmra.mxu3 %v1554_v59  ;;  %1679 = vmatmul.bf16.vlgmr.msra.gmra.mxu0 %v1554_v59 }
 0x785   : > { %1871 = vmatpush.bf16.msra.mxu2 %v2820_v62 }
 0x789   : > { %1872 = vmatpush.bf16.msra.mxu2 %v2819_v0 }
 0x78d   : > { %1873 = vmatpush.bf16.msra.mxu2 %v2818_v2 }
 0x791   : > { %1874 = vmatpush.bf16.msra.mxu2 %v2817_v4 }
 0x795   : > { %1875 = vmatpush.bf16.msra.mxu2 %v2816_v7 }
 0x799   : > { %1876 = vmatpush.bf16.msra.mxu2 %v2815_v10 }
 0x801   : > { %v1680_v11 = vpop.f32.mrf.mxu0 }
 0x802   : > { %v1681_v12 = vadd.f32 %v1680_v11, %v1574_v8 }
 0x804   : > { %v1686_v14 = vmul.f32 %v1681_v12, %v1681_v12 }
 0x806   : > { %v1690_v16 = vmul.f32 %v1686_v14, %v1681_v12 }
 0x807   : > { %v1666_v18 = vpop.f32.mrf.mxu3 }
 0x808   : > { %v1694_v19 = vmul.f32 0.044715, %v1690_v16  ;;  %v1667_v20 = vadd.f32 %v1666_v18, %v1573_v15 }
 0x809   : > { %v1682_v21 = vpop.f32.mrf.mxu0 }
 0x80a   : > { %v1698_v22 = vadd.f32 %v1694_v19, %v1681_v12  ;;  %v1685_v23 = vmul.f32 %v1667_v20, %v1667_v20  ;;  %v1683_v24 = vadd.f32 %v1682_v21, %v1574_v8 }
 0x80c   : > { %v1702_v25 = vmul.f32 0.7978846, %v1698_v22  ;;  %v1689_v26 = vmul.f32 %v1685_v23, %v1667_v20  ;;  %v1688_v27 = vmul.f32 %v1683_v24, %v1683_v24 }
 0x80e   : > { %v1693_v28 = vmul.f32 0.044715, %v1689_v26  ;;  %v1692_v29 = vmul.f32 %v1688_v27, %v1683_v24  ;;  %3002 = vtanh.f32 %v1702_v25 }
 0x80f   : > { %v1668_v30 = vpop.f32.mrf.mxu3 }
 0x810   : > { %v1697_v31 = vadd.f32 %v1693_v28, %v1667_v20  ;;  %v1696_v32 = vmul.f32 0.044715, %v1692_v29  ;;  %v1669_v33 = vadd.f32 %v1668_v30, %v1573_v15  ;;  %v2978_v30 = vld [vmem:[%s948_s27] ss:$0 sm:$0xff] }
 0x812   : > { %v1701_v34 = vmul.f32 0.7978846, %v1697_v31  ;;  %v1700_v35 = vadd.f32 %v1696_v32, %v1683_v24  ;;  %v1687_v36 = vmul.f32 %v1669_v33, %v1669_v33  ;;  %v2979_v32 = vld [vmem:[%s951_s3] ss:$0 sm:$0xff]  ;;  %s4030_s3 = sld [smem:[#allocation43_spill]] (!%p2686_p11) }
 0x814   : > { %v1704_v37 = vmul.f32 0.7978846, %v1700_v35  ;;  %v1691_v44 = vmul.f32 %v1687_v36, %v1669_v33  ;;  %3004 = vtanh.f32 %v1701_v34  ;;  %v3003_v39 = vpop.eup %3002 }
 0x815   : > { %v1710_v45 = vadd.f32 1.0, %v3003_v39 }
 0x816   : > { %3006 = vtanh.f32 %v1704_v37  ;;  %v1695_v40 = vmul.f32 0.044715, %v1691_v44 }
 0x817   : > { %v1714_v49 = vmul.f32 0.5, %v1710_v45 }
 0x818   : > { %v1699_v43 = vadd.f32 %v1695_v40, %v1669_v33  ;;  %s4031_s7 = smov (!%p2686_p11), %s4030_s3 }
 0x819   : > { %v1718_v53 = vmul.f32 %v1714_v49, %v1681_v12 }
 0x81a   : > { %v1703_v46 = vmul.f32 0.7978846, %v1699_v43  ;;  %v3005_v47 = vpop.eup %3004 }
 0x81b   : > { %v1709_v51 = vadd.f32 1.0, %v3005_v47 }
 0x81c   : > { %v3007_v48 = vpop.eup %3006  ;;  %3008 = vtanh.f32 %v1703_v46 }
 0x81d   : > { %v1712_v50 = vadd.f32 1.0, %v3007_v48  ;;  %v1713_v38 = vmul.f32 0.5, %v1709_v51 }
 0x81f   : > { %v1716_v52 = vmul.f32 0.5, %v1712_v50  ;;  %v1717_v60 = vmul.f32 %v1713_v38, %v1667_v20 }
 0x821   : > { %v1720_v54 = vmul.f32 %v1716_v52, %v1683_v24 }
 0x822   : > { %v3009_v55 = vpop.eup %3008 }
 0x823   : > { %v1711_v56 = vadd.f32 1.0, %v3009_v55  ;;  %v1722_v59 = vpack.c.bf16 %v1720_v54, %v1718_v53 }
 0x825   : > { %v1715_v42 = vmul.f32 0.5, %v1711_v56  ;;  %1877 = vmatmul.bf16.vlgmr.msra.gmra.mxu2 %v1722_v59 }
 0x827   : > { %v1719_v61 = vmul.f32 %v1715_v42, %v1669_v33 }
 0x829   : > { %v1721_v62 = vpack.c.bf16 %v1719_v61, %v1717_v60 }
 0x82b   : > { %1863 = vmatmul.bf16.vlgmr.msra.gmra.mxu1 %v1721_v62 }
 0x8a8   : > { %v1864_v0 = vpop.f32.mrf.mxu1  ;;  %v1878_v1 = vpop.f32.mrf.mxu2 }
 0x8a9   : > { %v1865_v2 = vadd.f32 %v2977_v63, %v1864_v0 }
 0x8ab   : > { %v1879_v3 = vadd.f32 %v1878_v1, %v1865_v2 }
 0x8ad   : > { %v1883_v4 = vadd.f32 %v1879_v3, %v3761_v57 }
 0x8af   : > { %1887 = vadd.xlane.f32.xlu0 %v1883_v4 }
 0x8b0   : > { %v1866_v5 = vpop.f32.mrf.mxu1  ;;  %v1880_v7 = vpop.f32.mrf.mxu2 }
 0x8b1   : > { %v1867_v6 = vadd.f32 %v2977_v63, %v1866_v5 }
 0x8b3   : > { %v1881_v8 = vadd.f32 %v1880_v7, %v1867_v6 }
 0x8b5   : > { %v1884_v9 = vadd.f32 %v1881_v8, %v3763_v58 }
 0x8b7   : > { %1889 = vadd.xlane.f32.xlu2 %v1884_v9 }
 0x922   : > { %v1888_v10 = vpop.xlane.xlu0 %1887 }
 0x923   : > { %v1891_v11 = vmul.f32 %v1888_v10, %v3703_v41 }
 0x925   : > { %v1893_v12 = vsub.f32 %v1883_v4, %v1891_v11 }
 0x927   : > { %v1895_v13 = vmul.f32 %v1893_v12, %v1893_v12 }
 0x929   : > { %1897 = vadd.xlane.f32.xlu0 %v1895_v13 }
 0x92a   : > { %v1890_v14 = vpop.xlane.xlu2 %1889 }
 0x92b   : > { %v1892_v15 = vmul.f32 %v1890_v14, %v3703_v41 }
 0x92d   : > { %v1894_v16 = vsub.f32 %v1884_v9, %v1892_v15 }
 0x92f   : > { %v1896_v17 = vmul.f32 %v1894_v16, %v1894_v16 }
 0x931   : > { %1899 = vadd.xlane.f32.xlu2 %v1896_v17 }
 0x99c   : > { %v1898_v57 = vpop.xlane.xlu0 %1897 }
 0x99d   : > { %v1901_v18 = vmul.f32 %v1898_v57, %v3703_v41 }
 0x99f   : > { %v1903_v19 = vadd.f32 1e-12, %v1901_v18 }
 0x9a1   : > { %3010 = vrsqrt.f32 %v1903_v19  ;;  %vm1911_vm1 = vweird.f32 %v1903_v19 }
 0x9a4   : > { %v1900_v58 = vpop.xlane.xlu2 %1899 }
 0x9a5   : > { %v1902_v20 = vmul.f32 %v1900_v58, %v3703_v41 }
 0x9a7   : > { %v3011_v21 = vpop.eup %3010  ;;  %v1904_v22 = vadd.f32 1e-12, %v1902_v20 }
 0x9a8   : > { %v1906_v23 = vmul.f32 %v3011_v21, %v1903_v19  ;;  %vm1912_vm0 = vweird.f32 %v3011_v21 }
 0x9a9   : > { %3012 = vrsqrt.f32 %v1904_v22  ;;  %vm1913_vm2 = vmor %vm1911_vm1, %vm1912_vm0  ;;  %vm1921_vm4 = vweird.f32 %v1904_v22 }
 0x9aa   : > { %v1907_v24 = vmul.f32 %v3011_v21, %v1906_v23 }
 0x9ac   : > { %v1908_v25 = vmul.f32 0.5, %v1907_v24 }
 0x9ae   : > { %v1909_v26 = vsub.f32 1.5, %v1908_v25 }
 0x9af   : > { %v3013_v27 = vpop.eup %3012 }
 0x9b0   : > { %v1910_v28 = vmul.f32 %v3011_v21, %v1909_v26  ;;  %v1916_v29 = vmul.f32 %v3013_v27, %v1904_v22  ;;  %vm1922_vm3 = vweird.f32 %v3013_v27 }
 0x9b1   : > { %vm1923_vm5 = vmor %vm1921_vm4, %vm1922_vm3 }
 0x9b2   : > { %v1914_v41 = vsel %vm1913_vm2, %v3011_v21, %v1910_v28  ;;  %v1917_v31 = vmul.f32 %v3013_v27, %v1916_v29 }
 0x9b3   : > { %v1925_v33 = vmul.f32 %v1914_v41, %v1893_v12 }
 0x9b4   : > { %v1918_v34 = vmul.f32 0.5, %v1917_v31 }
 0x9b5   : > { %v1930_v35 = vmul.f32 %v2978_v30, %v1925_v33 }
 0x9b6   : > { %v1919_v36 = vsub.f32 1.5, %v1918_v34 }
 0x9b7   : > { %v1935_v37 = vadd.f32 %v2979_v32, %v1930_v35 }
 0x9b8   : > { %v1920_v44 = vmul.f32 %v3013_v27, %v1919_v36 }
 0x9b9   : > { %1937 = vst [vmem:[%s3592_s1] sm:$0xff] %v1935_v37 }
 0x9ba   : > { %v1924_v39 = vsel %vm1923_vm5, %v3013_v27, %v1920_v44 }
 0x9bb   : > { %v1926_v40 = vmul.f32 %v1924_v39, %v1894_v16 }
 0x9bd   : > { %v1931_v43 = vmul.f32 %v2978_v30, %v1926_v40  ;;  %1942 = sbr.rel (%p2686_p11) target bundleno = 2812 (0xafc), region = 120 }
 0x9bf   : > { %v1936_v45 = vadd.f32 %v2979_v32, %v1931_v43 }
 0x9c1   : > { %1938 = vst [vmem:[%s3592_s1 + $0x8] sm:$0xff] %v1936_v45 }
 0x9c2   : > { %v2830_v46 = vld [vmem:[%s4030_s3 + $0x38] sm:$0xff]  ;;  %v2829_v47 = vld [vmem:[%s4031_s7 + $0x30] sm:$0xff]  ;;  %v2828_v50 = vld [vmem:[%s4031_s7 + $0x28] sm:$0xff]  ;;  %v1943_v56 = vpack.c.bf16 %v1936_v45, %v1935_v37 }
 0x9c3   : > { %2012 = vmatpush.bf16.msra.mxu0 %v2830_v46  ;;  %v2838_v48 = vld [vmem:[%s4032_s13 + $0x38] sm:$0xff]  ;;  %v2837_v49 = vld [vmem:[%s4032_s13 + $0x30] sm:$0xff]  ;;  %v2836_v51 = vld [vmem:[%s4032_s13 + $0x28] sm:$0xff] }
 0x9c4   : > { %2097 = vmatpush.bf16.msra.mxu1 %v2838_v48  ;;  %v2827_v52 = vld [vmem:[%s4031_s7 + $0x20] sm:$0xff]  ;;  %v2826_v53 = vld [vmem:[%s4031_s7 + $0x18] sm:$0xff]  ;;  %v2825_v54 = vld [vmem:[%s4031_s7 + $0x10] sm:$0xff] }
 0x9c5   : > { %v2824_v55 = vld [vmem:[%s4031_s7 + $0x8] sm:$0xff]  ;;  %v2823_v38 = vld [vmem:[%s4031_s7] sm:$0xff]  ;;  %v2834_v42 = vld [vmem:[%s4032_s13 + $0x18] sm:$0xff] }
 0x9c6   : > { %v2835_v59 = vld [vmem:[%s4032_s13 + $0x20] sm:$0xff]  ;;  %v2833_v60 = vld [vmem:[%s4032_s13 + $0x10] sm:$0xff]  ;;  %v2832_v61 = vld [vmem:[%s4032_s13 + $0x8] sm:$0xff] }
 0x9c7   : > { %2013 = vmatpush.bf16.msra.mxu0 %v2829_v47  ;;  %v2831_v62 = vld [vmem:[%s4032_s13] sm:$0xff] }
 0x9c8   : > { %2098 = vmatpush.bf16.msra.mxu1 %v2837_v49  ;;  %v3014_v0 = vld [vmem:[%s4033_s28] ss:$0 sm:$0xff] }
 0x9c9   : > { %v3015_v7 = vld [vmem:[%s4034_s14] ss:$0 sm:$0xff] }
 0x9cb   : > { %2014 = vmatpush.bf16.msra.mxu0 %v2828_v50 }
 0x9cc   : > { %2099 = vmatpush.bf16.msra.mxu1 %v2836_v51 }
 0x9cf   : > { %2015 = vmatpush.bf16.msra.mxu0 %v2827_v52 }
 0x9d0   : > { %2100 = vmatpush.bf16.msra.mxu1 %v2835_v59 }
 0x9d3   : > { %2016 = vmatpush.bf16.msra.mxu0 %v2826_v53 }
 0x9d4   : > { %2101 = vmatpush.bf16.msra.mxu1 %v2834_v42 }
 0x9d7   : > { %2017 = vmatpush.bf16.msra.mxu0 %v2825_v54 }
 0x9d8   : > { %2102 = vmatpush.bf16.msra.mxu1 %v2833_v60 }
 0x9db   : > { %2018 = vmatpush.bf16.msra.mxu0 %v2824_v55 }
 0x9dc   : > { %2103 = vmatpush.bf16.msra.mxu1 %v2832_v61 }
 0x9df   : > { %2019 = vmatpush.bf16.msra.mxu0 %v2823_v38 }
 0x9e0   : > { %2104 = vmatpush.bf16.msra.mxu1 %v2831_v62 }
 0x9e2   : > { %2020 = vmatmul.bf16.vlgmr.msra.gmra.mxu0 %v1943_v56 }
 0xa5f   : > { %v2021_v63 = vpop.f32.mrf.mxu0 }
 0xa60   : > { %v2022_v1 = vadd.f32 %v3014_v0, %v2021_v63 }
 0xa62   : > { %3016 = vtanh.f32 %v2022_v1 }
 0xa67   : > { %v2023_v2 = vpop.f32.mrf.mxu0 }
 0xa68   : > { %v2024_v3 = vadd.f32 %v3014_v0, %v2023_v2  ;;  %v3017_v4 = vpop.eup %3016 }
 0xa6a   : > { %3018 = vtanh.f32 %v2024_v3 }
 0xa70   : > { %v3019_v5 = vpop.eup %3018 }
 0xa71   : > { %v2028_v6 = vpack.c.bf16 %v3019_v5, %v3017_v4 }
 0xa73   : > { %2105 = vmatmul.bf16.vlgmr.msra.gmra.mxu1 %v2028_v6 }
 0xaf0   : > { %v2106_v8 = vpop.f32.mrf.mxu1 }
 0xaf1   : > { %v2107_v9 = vadd.f32 %v3015_v7, %v2106_v8 }
 0xaf3   : > { %2111 = vst [vmem:[%s3546_s10] sm:$0xff] %v2107_v9 }
 0xaf8   : > { %v2108_v10 = vpop.f32.mrf.mxu1 }
 0xaf9   : > { %v2109_v11 = vadd.f32 %v3015_v7, %v2108_v10 }
 0xafb   : > { %2112 = vst [vmem:[%s3546_s10 + $0x8] sm:$0xff] %v2109_v11 }
 0xafc PF: > { %s4035_s16 = sld [smem:[#allocation17_spill]]  ;;  %s2131_s5 = sshll.u32 %s3592_s1, 4  ;;  %s2132_s5 = int_to_ptr.vmem [resolvable:$true] %s2131_s5 }
 0xafd   : > { %s4036_s2 = sld [smem:[#allocation13_spill]] }
 0xafe   : > { %s4038_s17 = sld [smem:[#allocation47_spill]] }
 0xb02   : > { %s2839_s12 = sshll.u32 %s4035_s16, 4 }
 0xb03   : > { %s4039_s19 = sand.u32 1, %s4036_s2  }
 0xb04   : > { %s2130_s25 = scalar_lea.hbm %s4038_s17, %s2839_s12  ;;  %s2114_s22 = scalar_lea.sflag [#allocation4], %s4039_s19 }
 0xb05   : > { %s2133_s30 = sshll.u32 %s2130_s25, 4  ;;  %s3130_s24 = scalar_lea.hbm %s4038_s17, 32  ;;  %s2134_s30 = int_to_ptr.hbm [resolvable:$true] %s2133_s30 }
 0xb06   : > { %s3124_s23 = sshra.s32 %s2134_s30, 4  ;;  %s3125_s23 = int_to_ptr.hbm [resolvable:$true] %s3124_s23 }
 0xb07   : > { %s3126_s26 = scalar_lea.hbm %s3125_s23, 16  ;;  %p3131_p4 = scmp.lt.s32.totalorder %s3125_s23, %s4038_s17 }
 0xb08   : > { %p3127_p13 = scmp.ne.s32.totalorder %s3125_s23, %s3126_s26  ;;  %p3132_p5 = scmp.lt.s32.totalorder %s3130_s24, %s3126_s26 }
 0xb0a   : > { %p3128_p0 = pnand %p3127_p13, %p3449_p12  ;;  %p3133_p3 = por %p3132_p5, %p3131_p4 }
 0xb0c   : > { %p3129_p1 = pneg %p3128_p0 }
 0xb0e   : > { %p3134_p6 = pnand %p3133_p3, %p3129_p1 }
 0xb10   : > { %3137 = shalt.err (!%p3134_p6)
}
 0xb11   : > { %s3245_s1 = smov 128   ;;  %s3246_s4 = smov 8  }
 0xb12   : > { %2850 = dma.vmem_to_hbm [thread:$0]  (%p3449_p12), %s2132_s5, 256, %s2134_s30, %s2114_s22, %s3245_s1, %s3245_s1, %s3246_s4  }
 0xb13 PF: > { %s4040_s8 = sld [smem:[#allocation20_spill]] }
 0xb14   : > { %s4041_s9 = sld [smem:[#allocation12_spill]] }
 0xb19   : > { %p2867_p7 = scmp.ge.s32.totalorder %s4040_s8, 2 }
 0xb1a   : > { %s2152_s15 = sand.u32 1, %s4041_s9  }
 0xb1b   : > { %p2863_p9 = pnand %p2867_p7, %p3459_p2  ;;  %s2153_s28 = scalar_lea.sflag [#allocation4], %s2152_s15 }
 0xb1d   : > { %p2864_p10 = pneg %p2863_p9 }
 0xb1f   : > { %3191 = dma.done.wait (%p2864_p10), %s2153_s28, 256  }
 0xb20   : > { %3193 = vsyncadd (%p2864_p10), %s2153_s28, 4294967040  ;;  %s41_s5 = sadd.s32 1, %s4040_s8   ;;  %s4043_s2 = sld [smem:[#allocation13_spill]] }
 0xb21   : > { %p38_p8 = scmp.ge.s32.totalorder %s41_s5, 6   ;;  %s4044_s25 = sld [smem:[#allocation14_spill]] }
 0xb22   : > { %s4045_s26 = sld [smem:[#allocation24_spill]] }
 0xb23   : > { %s4046_s27 = sld [smem:[#allocation15_spill]] }
 0xb24   : > { %s4047_s3 = sld [smem:[#allocation16_spill]] }
 0xb25   : > { %s4048_s28 = sld [smem:[#allocation23_spill]]  ;;  %40 = sbr.rel (!%p38_p8) target bundleno = 34 (0x22), region = 222 }
 0xb26   : > { %s4049_s29 = sld [smem:[#allocation18_spill]] }
 0xb27   : > { %s4050_s0 = sld [smem:[#allocation19_spill]] }
 0xb28   : > { %s4051_s4 = sld [smem:[#allocation21_spill]] }
 0xb29   : > { %s4052_s30 = sld [smem:[#allocation22_spill]] }
 0xb2a   :  { %2167 = vsyncpa [#allocation3], 1 }
 0xb2b   :  { %2169 = vsyncpa [#allocation3 + $0x1], 1 }
 0xb2c   :  { %2170 = vsyncpa [#allocation6], 1 }
 0xb2d   :  { %2172 = vsyncpa [#allocation6 + $0x1], 1 }
 0xb2e   :  { %2173 = vsyncpa [#allocation4], 1 }
 0xb2f   :  { %2175 = vsyncpa [#allocation4 + $0x1], 1 }

</bundles_post_ra>
